<compile_context>
chip_gen: v6e
topology: v6e:2x2x1
jax: 0.10.0
libtpu: 0.0.40
codegen_flags: <defaults>
</compile_context>

<pallas_src>
import math

import jax
import jax.numpy as jnp
from jax.experimental import pallas as pl
from jax.experimental.pallas import tpu as pltpu


WINDOW_SIZE = 11
SIGMA = 1.5
C1 = 0.01 ** 2
C2 = 0.03 ** 2


def _gaussian_1d(window_size: int, sigma: float):
    """Normalized 1-D Gaussian taps (same as the PyTorch gaussian())."""
    g = [math.exp(-((x - window_size // 2) ** 2) / (2.0 * sigma ** 2))
         for x in range(window_size)]
    s = sum(g)
    return [v / s for v in g]


def _banded_conv_matrix(n: int, g):
    """(n, n) matrix M with M[i, k] = g[k - i + p] for |k - i| <= p.

    M @ x (and x @ M — M is symmetric for a symmetric window) is exactly the
    1-D "same" cross-correlation of x with g under zero padding.
    """
    K = len(g)
    p = K // 2
    rows = []
    for i in range(n):
        row = [0.0] * n
        for k in range(max(0, i - p), min(n, i + p + 1)):
            row[k] = g[k - i + p]
        rows.append(row)
    return jnp.asarray(rows, dtype=jnp.float32)


def _planes_per_step(num_planes: int, H: int, W: int) -> int:
    """How many planes to pack along the lane axis per grid step."""
    # Rough VMEM need per step: ~12 live (H, T*W) f32 slabs (inputs, products,
    # conv outputs, ssim map) + the (T*W, T*W) block-diagonal horizontal matrix.
    def vmem_bytes(t):
        return 12 * H * t * W * 4 + (t * W) * (t * W) * 4

    budget = 24 * 1024 * 1024   # comfortable under default scoped VMEM on v5e/v6e/v7x
    if vmem_bytes(num_planes) <= budget:
        return num_planes
    for t in range(num_planes - 1, 0, -1):
        # lane width of a non-full block must stay a multiple of 128
        if num_planes % t == 0 and (t * W) % 128 == 0 and vmem_bytes(t) <= budget:
            return t
    # TODO(synk): very large single planes (e.g. ~1k x 1k) would need spatial
    # tiling of W with a halo; fall back to a single step over everything.
    return num_planes


def _ssim_kernel(gv_ref, gh_ref, x1_ref, x2_ref, out_ref):
    """One grid step == T planes packed along the lane axis.

    gv_ref  : (H, H)     vertical Gaussian band matrix
    gh_ref  : (TW, TW)   block-diagonal horizontal Gaussian band matrix
    x1_ref  : (H, TW)    T image planes, lane-dense
    x2_ref  : (H, TW)
    out_ref : (1, TW)    per-column partial sums of the ssim map
    """
    gv = gv_ref[...]
    gh = gh_ref[...]
    x1 = x1_ref[...]
    x2 = x2_ref[...]

    def conv(z):
        # separable Gaussian "same" conv as two MXU matmuls
        v = jnp.dot(gv, z, preferred_element_type=jnp.float32,
                    precision=jax.lax.Precision.HIGHEST)
        return jnp.dot(v, gh, preferred_element_type=jnp.float32,
                       precision=jax.lax.Precision.HIGHEST)

    mu1 = conv(x1)
    mu2 = conv(x2)
    mu1_sq = mu1 * mu1
    mu2_sq = mu2 * mu2
    mu1_mu2 = mu1 * mu2
    sigma1_sq = conv(x1 * x1) - mu1_sq
    sigma2_sq = conv(x2 * x2) - mu2_sq
    sigma12 = conv(x1 * x2) - mu1_mu2

    num = (2.0 * mu1_mu2 + C1) * (2.0 * sigma12 + C2)
    den = (mu1_sq + mu2_sq + C1) * (sigma1_sq + sigma2_sq + C2)
    ssim_map = num * pl.reciprocal(den, approx=False)

    # sublane-only partial reduction; lane-dense store. Final mean in wrapper.
    out_ref[...] = jnp.sum(ssim_map, axis=0, keepdims=True)


def ssim_pallas(img1, img2, window_size: int = WINDOW_SIZE):
    """SSIM with size_average=True (scalar mean over the whole ssim_map)."""
    assert img1.shape == img2.shape
    B, C, H, W = img1.shape
    P = B * C

    # Lane-dense layout: plane p = b*C + c occupies columns [p*W, (p+1)*W).
    x1 = jnp.transpose(img1.astype(jnp.float32), (2, 0, 1, 3)).reshape(H, P * W)
    x2 = jnp.transpose(img2.astype(jnp.float32), (2, 0, 1, 3)).reshape(H, P * W)

    g = _gaussian_1d(window_size, SIGMA)
    gv = _banded_conv_matrix(H, g)        # (H, H)
    gh_w = _banded_conv_matrix(W, g)      # (W, W)

    T = _planes_per_step(P, H, W)
    G = P // T
    TW = T * W
    gh = jnp.kron(jnp.eye(T, dtype=jnp.float32), gh_w)   # (TW, TW) block-diag

    partial = pl.pallas_call(
        _ssim_kernel,
        out_shape=jax.ShapeDtypeStruct((1, P * W), jnp.float32),
        grid=(G,),
        in_specs=[
            pl.BlockSpec((H, H), lambda i: (0, 0)),      # Gv (shared)
            pl.BlockSpec((TW, TW), lambda i: (0, 0)),    # Gh block-diag (shared)
            pl.BlockSpec((H, TW), lambda i: (0, i)),     # x1 plane group
            pl.BlockSpec((H, TW), lambda i: (0, i)),     # x2 plane group
        ],
        out_specs=pl.BlockSpec((1, TW), lambda i: (0, i)),
        compiler_params=pltpu.CompilerParams(
            dimension_semantics=("parallel",)),
    )(gv, gh, x1, x2)

    return jnp.sum(partial) / float(P * H * W)


def _ssim_reference(img1, img2, window_size: int = WINDOW_SIZE):
    """Pure-JAX reference (lax depthwise conv), mirrors the PyTorch _ssim."""
    B, C, H, W = img1.shape
    K = window_size
    g = jnp.asarray(_gaussian_1d(K, SIGMA), dtype=jnp.float32)
    w2d = jnp.outer(g, g)
    win = jnp.broadcast_to(w2d, (C, 1, K, K))

    def conv(x):
        return jax.lax.conv_general_dilated(
            x, win, window_strides=(1, 1), padding=[(K // 2, K // 2)] * 2,
            dimension_numbers=("NCHW", "OIHW", "NCHW"), feature_group_count=C,
            precision=jax.lax.Precision.HIGHEST)

    mu1, mu2 = conv(img1), conv(img2)
    mu1_sq, mu2_sq, mu1_mu2 = mu1 * mu1, mu2 * mu2, mu1 * mu2
    sigma1_sq = conv(img1 * img1) - mu1_sq
    sigma2_sq = conv(img2 * img2) - mu2_sq
    sigma12 = conv(img1 * img2) - mu1_mu2
    ssim_map = ((2 * mu1_mu2 + C1) * (2 * sigma12 + C2)
                / ((mu1_sq + mu2_sq + C1) * (sigma1_sq + sigma2_sq + C2)))
    return jnp.mean(ssim_map)


if __name__ == "__main__":
    key = jax.random.PRNGKey(0)
    k1, k2 = jax.random.split(key)
    B, C, H, W = 2, 4, 16, 16
    img1 = jax.random.uniform(k1, (B, C, H, W), dtype=jnp.float32)
    # img2 = noisy version of img1 so SSIM is a meaningful, well-conditioned value
    img2 = img1 + 0.1 * jax.random.normal(k2, (B, C, H, W), dtype=jnp.float32)

    out = ssim_pallas(img1, img2)
    out = jax.block_until_ready(out)

    ref = _ssim_reference(img1, img2)
    assert jnp.allclose(out, ref, rtol=1e-3, atol=1e-4), (out, ref)

    print("KERNEL_OK")
</pallas_src>

<mosaic_0001>
module attributes {stable_mosaic.version = 11 : i64} {
  func.func @_ssim_kernel(%arg0: i32, %arg1: memref<16x16xf32, #tpu.memory_space<vmem>>, %arg2: memref<128x128xf32, #tpu.memory_space<vmem>>, %arg3: memref<16x128xf32, #tpu.memory_space<vmem>>, %arg4: memref<16x128xf32, #tpu.memory_space<vmem>>, %arg5: memref<1x128xf32, #tpu.memory_space<vmem>>) attributes {dimension_semantics = [#tpu.dimension_semantics<parallel>], iteration_bounds = array<i64: 1>, scalar_prefetch = 0 : i64, scratch_operands = 0 : i64, tpu.core_type = #tpu.core_type<tc>, window_params = [{pipeline_mode = #tpu.pipeline_mode<synchronous>, transform_indices = @transform_0, window_bounds = array<i64: 16, 16>}, {pipeline_mode = #tpu.pipeline_mode<synchronous>, transform_indices = @transform_1, window_bounds = array<i64: 128, 128>}, {transform_indices = @transform_2, window_bounds = array<i64: 16, 128>}, {transform_indices = @transform_3, window_bounds = array<i64: 16, 128>}, {transform_indices = @transform_4, window_bounds = array<i64: 1, 128>}]} {
    %c0 = arith.constant 0 : index
    %c0_0 = arith.constant 0 : index
    %0 = vector.load %arg1[%c0, %c0_0] : memref<16x16xf32, #tpu.memory_space<vmem>>, vector<16x16xf32>
    %c0_1 = arith.constant 0 : index
    %c0_2 = arith.constant 0 : index
    %1 = vector.load %arg2[%c0_1, %c0_2] : memref<128x128xf32, #tpu.memory_space<vmem>>, vector<128x128xf32>
    %c0_3 = arith.constant 0 : index
    %c0_4 = arith.constant 0 : index
    %2 = vector.load %arg3[%c0_3, %c0_4] : memref<16x128xf32, #tpu.memory_space<vmem>>, vector<16x128xf32>
    %c0_5 = arith.constant 0 : index
    %c0_6 = arith.constant 0 : index
    %3 = vector.load %arg4[%c0_5, %c0_6] : memref<16x128xf32, #tpu.memory_space<vmem>>, vector<16x128xf32>
    %cst = arith.constant dense<0.000000e+00> : vector<16x128xf32>
    %4 = tpu.matmul %0, %2, %cst {dimension_numbers = #tpu.dot_dimension_numbers<[1], [0], [0], [1], [0, 0, 1, 1], [], []>, precision = #tpu.contract_precision<fp32>} : vector<16x16xf32>, vector<16x128xf32>, vector<16x128xf32> -> vector<16x128xf32>
    %cst_7 = arith.constant dense<0.000000e+00> : vector<16x128xf32>
    %5 = tpu.matmul %4, %1, %cst_7 {dimension_numbers = #tpu.dot_dimension_numbers<[1], [0], [0], [1], [0, 0, 1, 1], [], []>, precision = #tpu.contract_precision<fp32>} : vector<16x128xf32>, vector<128x128xf32>, vector<16x128xf32> -> vector<16x128xf32>
    %cst_8 = arith.constant dense<0.000000e+00> : vector<16x128xf32>
    %6 = tpu.matmul %0, %3, %cst_8 {dimension_numbers = #tpu.dot_dimension_numbers<[1], [0], [0], [1], [0, 0, 1, 1], [], []>, precision = #tpu.contract_precision<fp32>} : vector<16x16xf32>, vector<16x128xf32>, vector<16x128xf32> -> vector<16x128xf32>
    %cst_9 = arith.constant dense<0.000000e+00> : vector<16x128xf32>
    %7 = tpu.matmul %6, %1, %cst_9 {dimension_numbers = #tpu.dot_dimension_numbers<[1], [0], [0], [1], [0, 0, 1, 1], [], []>, precision = #tpu.contract_precision<fp32>} : vector<16x128xf32>, vector<128x128xf32>, vector<16x128xf32> -> vector<16x128xf32>
    %8 = arith.mulf %5, %5 : vector<16x128xf32>
    %9 = arith.mulf %7, %7 : vector<16x128xf32>
    %10 = arith.mulf %5, %7 : vector<16x128xf32>
    %11 = arith.mulf %2, %2 : vector<16x128xf32>
    %cst_10 = arith.constant dense<0.000000e+00> : vector<16x128xf32>
    %12 = tpu.matmul %0, %11, %cst_10 {dimension_numbers = #tpu.dot_dimension_numbers<[1], [0], [0], [1], [0, 0, 1, 1], [], []>, precision = #tpu.contract_precision<fp32>} : vector<16x16xf32>, vector<16x128xf32>, vector<16x128xf32> -> vector<16x128xf32>
    %cst_11 = arith.constant dense<0.000000e+00> : vector<16x128xf32>
    %13 = tpu.matmul %12, %1, %cst_11 {dimension_numbers = #tpu.dot_dimension_numbers<[1], [0], [0], [1], [0, 0, 1, 1], [], []>, precision = #tpu.contract_precision<fp32>} : vector<16x128xf32>, vector<128x128xf32>, vector<16x128xf32> -> vector<16x128xf32>
    %14 = arith.subf %13, %8 : vector<16x128xf32>
    %15 = arith.mulf %3, %3 : vector<16x128xf32>
    %cst_12 = arith.constant dense<0.000000e+00> : vector<16x128xf32>
    %16 = tpu.matmul %0, %15, %cst_12 {dimension_numbers = #tpu.dot_dimension_numbers<[1], [0], [0], [1], [0, 0, 1, 1], [], []>, precision = #tpu.contract_precision<fp32>} : vector<16x16xf32>, vector<16x128xf32>, vector<16x128xf32> -> vector<16x128xf32>
    %cst_13 = arith.constant dense<0.000000e+00> : vector<16x128xf32>
    %17 = tpu.matmul %16, %1, %cst_13 {dimension_numbers = #tpu.dot_dimension_numbers<[1], [0], [0], [1], [0, 0, 1, 1], [], []>, precision = #tpu.contract_precision<fp32>} : vector<16x128xf32>, vector<128x128xf32>, vector<16x128xf32> -> vector<16x128xf32>
    %18 = arith.subf %17, %9 : vector<16x128xf32>
    %19 = arith.mulf %2, %3 : vector<16x128xf32>
    %cst_14 = arith.constant dense<0.000000e+00> : vector<16x128xf32>
    %20 = tpu.matmul %0, %19, %cst_14 {dimension_numbers = #tpu.dot_dimension_numbers<[1], [0], [0], [1], [0, 0, 1, 1], [], []>, precision = #tpu.contract_precision<fp32>} : vector<16x16xf32>, vector<16x128xf32>, vector<16x128xf32> -> vector<16x128xf32>
    %cst_15 = arith.constant dense<0.000000e+00> : vector<16x128xf32>
    %21 = tpu.matmul %20, %1, %cst_15 {dimension_numbers = #tpu.dot_dimension_numbers<[1], [0], [0], [1], [0, 0, 1, 1], [], []>, precision = #tpu.contract_precision<fp32>} : vector<16x128xf32>, vector<128x128xf32>, vector<16x128xf32> -> vector<16x128xf32>
    %22 = arith.subf %21, %10 : vector<16x128xf32>
    %cst_16 = arith.constant 2.000000e+00 : f32
    %23 = vector.broadcast %cst_16 : f32 to vector<16x128xf32>
    %24 = arith.mulf %23, %10 : vector<16x128xf32>
    %cst_17 = arith.constant 9.99999974E-5 : f32
    %25 = vector.broadcast %cst_17 : f32 to vector<16x128xf32>
    %26 = arith.addf %24, %25 : vector<16x128xf32>
    %cst_18 = arith.constant 2.000000e+00 : f32
    %27 = vector.broadcast %cst_18 : f32 to vector<16x128xf32>
    %28 = arith.mulf %27, %22 : vector<16x128xf32>
    %cst_19 = arith.constant 8.99999984E-4 : f32
    %29 = vector.broadcast %cst_19 : f32 to vector<16x128xf32>
    %30 = arith.addf %28, %29 : vector<16x128xf32>
    %31 = arith.mulf %26, %30 : vector<16x128xf32>
    %32 = arith.addf %8, %9 : vector<16x128xf32>
    %cst_20 = arith.constant 9.99999974E-5 : f32
    %33 = vector.broadcast %cst_20 : f32 to vector<16x128xf32>
    %34 = arith.addf %32, %33 : vector<16x128xf32>
    %35 = arith.addf %14, %18 : vector<16x128xf32>
    %cst_21 = arith.constant 8.99999984E-4 : f32
    %36 = vector.broadcast %cst_21 : f32 to vector<16x128xf32>
    %37 = arith.addf %35, %36 : vector<16x128xf32>
    %38 = arith.mulf %34, %37 : vector<16x128xf32>
    %39 = tpu.reciprocal %38 : vector<16x128xf32> -> vector<16x128xf32>
    %40 = arith.mulf %31, %39 : vector<16x128xf32>
    %cst_22 = arith.constant dense<0.000000e+00> : vector<128xf32>
    %41 = vector.multi_reduction <add>, %40, %cst_22 [0] : vector<16x128xf32> to vector<128xf32>
    %42 = vector.shape_cast %41 : vector<128xf32> to vector<1x128xf32>
    %c0_23 = arith.constant 0 : index
    %c0_24 = arith.constant 0 : index
    %43 = vector.load %arg5[%c0_23, %c0_24] : memref<1x128xf32, #tpu.memory_space<vmem>>, vector<1x128xf32>
    tpu.vector_store %arg5[%c0_23, %c0_24], %42 {strides = array<i32>} : memref<1x128xf32, #tpu.memory_space<vmem>>, vector<1x128xf32>,
    return
  }
  func.func @transform_0(%arg0: i32) -> (i32, i32) {
    %c0_i32 = arith.constant 0 : i32
    %c0_i32_0 = arith.constant 0 : i32
    %c0_i32_1 = arith.constant 0 : i32
    return %c0_i32, %c0_i32_0 : i32, i32
  }
  func.func @transform_1(%arg0: i32) -> (i32, i32) {
    %c0_i32 = arith.constant 0 : i32
    %c0_i32_0 = arith.constant 0 : i32
    %c0_i32_1 = arith.constant 0 : i32
    return %c0_i32, %c0_i32_0 : i32, i32
  }
  func.func @transform_2(%arg0: i32) -> (i32, i32) {
    %c0_i32 = arith.constant 0 : i32
    %c0_i32_0 = arith.constant 0 : i32
    return %c0_i32, %arg0 : i32, i32
  }
  func.func @transform_3(%arg0: i32) -> (i32, i32) {
    %c0_i32 = arith.constant 0 : i32
    %c0_i32_0 = arith.constant 0 : i32
    return %c0_i32, %arg0 : i32, i32
  }
  func.func @transform_4(%arg0: i32) -> (i32, i32) {
    %c0_i32 = arith.constant 0 : i32
    %c0_i32_0 = arith.constant 0 : i32
    return %c0_i32, %arg0 : i32, i32
  }
}

</mosaic_0001>

<bundles_post_ra>
// kernel: tpu_custom_call.1
= control target key start
LH: loop header
LB: loop body
LE: loop exit
PB: predicated region body
PF: predicated region fallthrough
CT: control target
= control target key end

     0   :  { %9 = vsyncpa [#allocation3], 0  ;;  %s9702_s0 = inlined_call_operand.hbm [shape: f32[16,16], index: 0, kind: input, shape index: {}]   ;;  %s9703_s1 = inlined_call_operand.hbm [shape: f32[128,128], index: 1, kind: input, shape index: {}]   ;;  %s9704_s2 = inlined_call_operand.hbm [shape: f32[16,128], index: 2, kind: input, shape index: {}]   ;;  %s9705_s3 = inlined_call_operand.hbm [shape: f32[16,128], index: 3, kind: input, shape index: {}]   ;;  %s9706_s4 = inlined_call_operand.hbm [shape: f32[1,128], index: 4, kind: output, shape index: {}]  }
   0x1   :  { %10 = vsyncpa [#allocation6], 0 }
   0x2   :  { %11 = vsyncpa [#allocation9], 0 }
   0x3   :  { %12 = vsyncpa [#allocation4], 0  ;;  %s8144_s15 = smov [#allocation5]   ;;  %s8145_s17 = smov [#allocation2]  }
   0x4   :  { %s30_s16 = sshll.u32 %s8144_s15, 4  ;;  %s18_s18 = sshll.u32 %s8145_s17, 4  ;;  %s31_s16 = int_to_ptr.vmem [resolvable:$true] %s30_s16  ;;  %s19_s18 = int_to_ptr.vmem [resolvable:$true] %s18_s18 }
   0x5   :  { %s8044_s19 = scalar_lea.vmem %s31_s16, 2048  ;;  %p8049_p1 = scmp.lt.s32.totalorder %s31_s16, %s31_s16 }
   0x6   :  { %p8045_p0 = scmp.ne.s32.totalorder %s31_s16, %s8044_s19  ;;  %p8050_p2 = scmp.lt.s32.totalorder %s8044_s19, %s8044_s19 }
   0x8   :  { %p8051_p3 = por %p8050_p2, %p8049_p1 }
   0xa   :  { %p8052_p4 = pnand %p8051_p3, %p8045_p0 }
   0xc   :  { %8055 = shalt.err (!%p8052_p4)
}
   0xd   :  { %s8146_s20 = smov 128   ;;  %s8147_s21 = smov 8  }
   0xe   :  { %36 = dma.hbm_to_vmem [thread:$0]  %s9703_s1, 2048, %s31_s16, [#allocation6], %s8146_s20, %s8146_s20, %s8147_s21  }
   0xf   :  { %s8064_s24 = scalar_lea.vmem %s19_s18, 256  ;;  %p8069_p6 = scmp.lt.s32.totalorder %s19_s18, %s19_s18 }
  0x10   :  { %p8065_p5 = scmp.ne.s32.totalorder %s19_s18, %s8064_s24  ;;  %p8070_p7 = scmp.lt.s32.totalorder %s8064_s24, %s8064_s24 }
  0x12   :  { %p8071_p8 = por %p8070_p7, %p8069_p6 }
  0x14   :  { %p8072_p9 = pnand %p8071_p8, %p8065_p5 }
  0x16   :  { %8075 = shalt.err (!%p8072_p9)
}
  0x17   :  { %24 = dma.hbm_to_vmem [thread:$0]  %s9702_s0, 256, %s19_s18, [#allocation3], %s8146_s20, %s8146_s20, %s8147_s21  }
  0x18   :  { %s8148_s27 = smov [#allocation7]   ;;  %s8149_s29 = smov [#allocation8]  }
  0x19   :  { %s42_s28 = sshll.u32 %s8148_s27, 4  ;;  %s54_s30 = sshll.u32 %s8149_s29, 4  ;;  %s43_s28 = int_to_ptr.vmem [resolvable:$true] %s42_s28  ;;  %s55_s30 = int_to_ptr.vmem [resolvable:$true] %s54_s30 }
  0x1a   :  { %s8084_s1 = scalar_lea.vmem %s43_s28, 256  ;;  %p8089_p11 = scmp.lt.s32.totalorder %s43_s28, %s43_s28 }
  0x1b   :  { %p8085_p10 = scmp.ne.s32.totalorder %s43_s28, %s8084_s1  ;;  %p8090_p12 = scmp.lt.s32.totalorder %s8084_s1, %s8084_s1 }
  0x1d   :  { %p8091_p13 = por %p8090_p12, %p8089_p11 }
  0x1f   :  { %p8092_p0 = pnand %p8091_p13, %p8085_p10 }
  0x21   :  { %8095 = shalt.err (!%p8092_p0)
}
  0x22   :  { %48 = dma.hbm_to_vmem [thread:$0]  %s9704_s2, 256, %s43_s28, [#allocation6], %s8146_s20, %s8146_s20, %s8147_s21  }
  0x23   :  { %s8104_s0 = scalar_lea.vmem %s55_s30, 256  ;;  %p8109_p2 = scmp.lt.s32.totalorder %s55_s30, %s55_s30 }
  0x24   :  { %p8105_p1 = scmp.ne.s32.totalorder %s55_s30, %s8104_s0  ;;  %p8110_p3 = scmp.lt.s32.totalorder %s8104_s0, %s8104_s0 }
  0x26   :  { %p8111_p4 = por %p8110_p3, %p8109_p2 }
  0x28   :  { %p8112_p5 = pnand %p8111_p4, %p8105_p1 }
  0x2a   :  { %8115 = shalt.err (!%p8112_p5)
}
  0x2b   :  { %60 = dma.hbm_to_vmem [thread:$0]  %s9705_s3, 256, %s55_s30, [#allocation9], %s8146_s20, %s8146_s20, %s8147_s21  }
  0x2c   :  { %8136 = dma.done.wait [#allocation3], 256  }
  0x2d   :  { %8137 = vsyncadd [#allocation3], 4294967040 }
  0x2e   :  { %8138 = dma.done.wait [#allocation6], 2304  }
  0x2f   :  { %8139 = vsyncadd [#allocation6], 4294964992 }
  0x30   :  { %8140 = dma.done.wait [#allocation9], 256  }
  0x31   :  { %8141 = vsyncadd [#allocation9], 4294967040  ;;  %vm95_vm0 = vcmask 130048   ;;  %v92_v0 = vld [vmem:[#allocation7 + $0x8] sm:$0xff]  ;;  %v91_v1 = vld [vmem:[#allocation7] sm:$0xff]  ;;  %s8150_s2 = smov [#allocation10]  }
  0x32   :  { %v73_v2 = vld [vmem:[#allocation2] sm:$0xff]  ;;  %v8200_v3 = vand.u32 4294901760, %v92_v0  ;;  %v8202_v4 = vand.u32 4294901760, %v91_v1  ;;  %v74_v6 = vld [vmem:[#allocation2 + $0x8] sm:$0xff]  ;;  %v88_v23 = vld [vmem:[#allocation5 + $0x68] sm:$0xff]  ;;  %s6088_s3 = sshll.u32 %s8150_s2, 4  ;;  %s6089_s3 = int_to_ptr.vmem [resolvable:$true] %s6088_s3 }
  0x33   :  { %v97_v5 = vsel %vm95_vm0, %v73_v2, 0  ;;  %v100_v8 = vsel %vm95_vm0, %v74_v6, 0  ;;  %v90_v12 = vld [vmem:[#allocation5 + $0x78] sm:$0xff]  ;;  %v89_v17 = vld [vmem:[#allocation5 + $0x70] sm:$0xff]  ;;  %v87_v29 = vld [vmem:[#allocation5 + $0x60] sm:$0xff]  ;;  %v8240_v32 = vand.u32 4294901760, %v88_v23  ;;  %p8121_p7 = scmp.lt.s32.totalorder %s6089_s3, %s6089_s3 }
  0x34   :  { %v8204_v7 = vand.u32 4294901760, %v97_v5  ;;  %6759 = vmatprep.subr.mxu0 %v8200_v3  ;;  %v219_v9 = vsub.f32 %v92_v0, %v8200_v3  ;;  %v8208_v10 = vand.u32 4294901760, %v100_v8  ;;  %v226_v11 = vsub.f32 %v91_v1, %v8202_v4  ;;  %v86_v34 = vld [vmem:[#allocation5 + $0x58] sm:$0xff]  ;;  %v85_v37 = vld [vmem:[#allocation5 + $0x50] sm:$0xff]  ;;  %v84_v41 = vld [vmem:[#allocation5 + $0x48] sm:$0xff]  ;;  %s8116_s9 = scalar_lea.vmem %s6089_s3, 16 }
  0x35   :  { %6760 = vmatpush3.msra.mxu0 %v8200_v3  ;;  %v8224_v19 = vand.u32 4294901760, %v90_v12  ;;  %v8231_v25 = vand.u32 4294901760, %v89_v17  ;;  %v8248_v36 = vand.u32 4294901760, %v87_v29  ;;  %v8255_v39 = vsub.f32 %v88_v23, %v8240_v32  ;;  %v83_v45 = vld [vmem:[#allocation5 + $0x40] sm:$0xff]  ;;  %p8117_p6 = scmp.ne.s32.totalorder %s6089_s3, %s8116_s9  ;;  %s8120_s10 = scalar_lea.vmem %s6089_s3, 32 }
  0x36   :  { %9874 = vst [vmem:[#allocation15_spill] sm:$0xff] %v8204_v7  ;;  %9875 = vst [vmem:[#allocation16_spill] sm:$0xff] %v8208_v10  ;;  %v8213_v13 = vsub.f32 %v97_v5, %v8204_v7  ;;  %6770 = vmatprep.mubr.f32.mxu1 %v8204_v7  ;;  %6761 = vmatprep.subr.mxu0 %v8202_v4  ;;  %v220_v14 = vand.u32 4294901760, %v219_v9  ;;  %v8218_v15 = vsub.f32 %v100_v8, %v8208_v10  ;;  %p8122_p8 = scmp.lt.s32.totalorder %s8120_s10, %s8116_s9 }
  0x37   :  { %v227_v16 = vand.u32 4294901760, %v226_v11  ;;  %6762 = vmatpush3.msra.mxu0 %v8202_v4  ;;  %v8238_v31 = vsub.f32 %v90_v12, %v8224_v19  ;;  %v8246_v35 = vsub.f32 %v89_v17, %v8231_v25  ;;  %v8257_v40 = vand.u32 4294901760, %v86_v34  ;;  %v82_v12 = vld [vmem:[#allocation5 + $0x38] sm:$0xff] }
  0x38   :  { %9876 = vst [vmem:[#allocation17_spill] sm:$0xff] %v8213_v13  ;;  %9877 = vst [vmem:[#allocation18_spill] sm:$0xff] %v8218_v15  ;;  %v8222_v18 = vand.u32 4294901760, %v8213_v13  ;;  %v221_v20 = vsub.f32 %v219_v9, %v220_v14  ;;  %v8227_v21 = vand.u32 4294901760, %v8218_v15  ;;  %6773 = vmatprep.subr.mxu0 %v219_v9  ;;  %v8265_v43 = vsub.f32 %v87_v29, %v8248_v36  ;;  %p8123_p9 = por %p8122_p8, %p8121_p7 }
  0x39   :  { %v228_v22 = vsub.f32 %v226_v11, %v227_v16  ;;  %v8252_v38 = vand.u32 4294901760, %v8238_v31  ;;  %v8262_v42 = vand.u32 4294901760, %v8246_v35  ;;  %v8267_v44 = vand.u32 4294901760, %v85_v37 }
  0x3a   :  { %9878 = vst [vmem:[#allocation19_spill] sm:$0xff] %v8222_v18  ;;  %9879 = vst [vmem:[#allocation20_spill] sm:$0xff] %v8227_v21  ;;  %v172_v24 = vsub.f32 %v8213_v13, %v8222_v18  ;;  %v222_v26 = vand.u32 4294901760, %v221_v20  ;;  %v182_v27 = vsub.f32 %v8218_v15, %v8227_v21  ;;  %v8276_v47 = vand.u32 4294901760, %v8255_v39  ;;  %p8124_p10 = pnand %p8123_p9, %p8117_p6 }
  0x3b   :  { %v229_v28 = vand.u32 4294901760, %v228_v22  ;;  %v709_v46 = vsub.f32 %v8238_v31, %v8252_v38  ;;  %v8279_v48 = vsub.f32 %v86_v34, %v8257_v40  ;;  %v8281_v49 = vand.u32 4294901760, %v84_v41  ;;  %v80_v22 = vld [vmem:[#allocation5 + $0x28] sm:$0xff] }
  0x3c   :  { %v8235_v30 = vand.u32 4294901760, %v172_v24  ;;  %6766 = vmatprep.subr.mxu1 %v222_v26  ;;  %v8242_v33 = vand.u32 4294901760, %v182_v27  ;;  %v716_v50 = vsub.f32 %v8246_v35, %v8262_v42  ;;  %v8288_v51 = vand.u32 4294901760, %v8265_v43  ;;  %v79_v27 = vld [vmem:[#allocation5 + $0x20] sm:$0xff] }
  0x3d   :  { %6767 = vmatpush3.msra.mxu1 %v222_v26  ;;  %v8291_v52 = vsub.f32 %v85_v37, %v8267_v44  ;;  %v8293_v53 = vand.u32 4294901760, %v83_v45  ;;  %v8297_v54 = vand.u32 4294901760, %v709_v46  ;;  %v723_v55 = vsub.f32 %v8255_v39, %v8276_v47 }
  0x3e   :  { %9880 = vst [vmem:[#allocation21_spill] sm:$0xff] %v8235_v30  ;;  %9881 = vst [vmem:[#allocation22_spill] sm:$0xff] %v8242_v33  ;;  %6763 = vmatprep.mubr.f32.mxu0 %v8235_v30  ;;  %6768 = vmatprep.subr.mxu1 %v229_v28  ;;  %v8302_v56 = vand.u32 4294901760, %v8279_v48  ;;  %v8305_v57 = vsub.f32 %v84_v41, %v8281_v49  ;;  %v8311_v58 = vand.u32 4294901760, %v716_v50  ;;  %v8397_v26 = vand.u32 4294901760, %v80_v22  ;;  %v78_v41 = vld [vmem:[#allocation5 + $0x18] sm:$0xff] }
  0x3f   :  { %6764 = vmatmul.mubr.f32.vlgmr.msra.gmra.mxu0 %v8242_v33  ;;  %6769 = vmatpush3.msra.mxu1 %v229_v28  ;;  %9882 = vst [vmem:[#allocation23_spill] sm:$0xff] %v8297_v54  ;;  %v730_v59 = vsub.f32 %v8265_v43, %v8288_v51  ;;  %v8316_v60 = vand.u32 4294901760, %v8291_v52  ;;  %v8319_v61 = vsub.f32 %v83_v45, %v8293_v53  ;;  %v8325_v62 = vand.u32 4294901760, %v723_v55 }
  0x40   :  { %6774 = vmatpush3.msra.mxu0 %v219_v9  ;;  %6771 = vmatmul.mubr.f32.vlgmr.msra.gmra.mxu1 %v8208_v10  ;;  %9883 = vst [vmem:[#allocation24_spill] sm:$0xff] %v8302_v56  ;;  %9884 = vst [vmem:[#allocation25_spill] sm:$0xff] %v8311_v58  ;;  %v737_v63 = vsub.f32 %v8279_v48, %v8302_v56  ;;  %v8330_v0 = vand.u32 4294901760, %v8305_v57  ;;  %v8407_v34 = vsub.f32 %v80_v22, %v8397_v26  ;;  %v76_v22 = vld [vmem:[#allocation5 + $0x8] sm:$0xff] }
  0x41   :  { %6775 = vmatprep.subr.mxu0 %v226_v11  ;;  %6780 = vmatprep.subr.mxu1 %v8200_v3  ;;  %9885 = vst [vmem:[#allocation26_spill] sm:$0xff] %v8316_v60  ;;  %9886 = vst [vmem:[#allocation27_spill] sm:$0xff] %v8325_v62  ;;  %v8335_v1 = vand.u32 4294901760, %v730_v59  ;;  %v744_v2 = vsub.f32 %v8291_v52, %v8316_v60  ;;  %v8409_v37 = vand.u32 4294901760, %v79_v27  ;;  %v8424_v59 = vand.u32 4294901760, %v78_v41 }
  0x42   :  { %6776 = vmatpush3.msra.mxu0 %v226_v11  ;;  %6777 = vmatprep.mubr.f32.mxu0 %v8213_v13  ;;  %9887 = vst [vmem:[#allocation28_spill] sm:$0xff] %v8330_v0  ;;  %v751_v5 = vsub.f32 %v8305_v57, %v8330_v0  ;;  %v8418_v50 = vand.u32 4294901760, %v8407_v34 }
  0x43   :  { %6781 = vmatpush3.msra.mxu1 %v8200_v3  ;;  %6778 = vmatmul.mubr.f32.vlgmr.msra.gmra.mxu0 %v8218_v15  ;;  %9888 = vst [vmem:[#allocation29_spill] sm:$0xff] %v8335_v1  ;;  %v8354_v6 = vand.u32 4294901760, %v744_v2  ;;  %v8421_v55 = vsub.f32 %v79_v27, %v8409_v37 }
  0x44   :  { %6782 = vmatprep.subr.mxu1 %v8202_v4  ;;  %6787 = vmatprep.subr.mxu0 %v220_v14  ;;  %v8362_v9 = vand.u32 4294901760, %v751_v5  ;;  %9897 = vst [vmem:[#allocation38_spill] sm:$0xff] %v8418_v50  ;;  %v779_v5 = vsub.f32 %v8407_v34, %v8418_v50 }
  0x45   :  { %6783 = vmatpush3.msra.mxu1 %v8202_v4  ;;  %6784 = vmatprep.mubr.f32.mxu1 %v8222_v18  ;;  %9891 = vst [vmem:[#allocation32_spill] sm:$0xff] %v8354_v6 }
  0x46   :  { %6788 = vmatpush3.msra.mxu0 %v220_v14  ;;  %6785 = vmatmul.mubr.f32.vlgmr.msra.gmra.mxu1 %v8227_v21  ;;  %9892 = vst [vmem:[#allocation33_spill] sm:$0xff] %v8362_v9  ;;  %v8382_v14 = vand.u32 4294901760, %v82_v12  ;;  %v8443_v27 = vand.u32 4294901760, %v779_v5 }
  0x47   :  { %6789 = vmatprep.subr.mxu0 %v227_v16  ;;  %6794 = vmatprep.subr.mxu1 %v8200_v3 }
  0x48   :  { %6790 = vmatpush3.msra.mxu0 %v227_v16  ;;  %6791 = vmatprep.mubr.f32.mxu0 %v8204_v7  ;;  %v81_v16 = vld [vmem:[#allocation5 + $0x30] sm:$0xff]  ;;  %v8385_v17 = vsub.f32 %v82_v12, %v8382_v14  ;;  %9900 = vst [vmem:[#allocation41_spill] sm:$0xff] %v8443_v27 }
  0x49   :  { %6795 = vmatpush3.msra.mxu1 %v8200_v3  ;;  %6792 = vmatmul.mubr.f32.vlgmr.msra.gmra.mxu0 %v8208_v10  ;;  %v8341_v3 = vand.u32 4294901760, %v8319_v61  ;;  %v8387_v20 = vand.u32 4294901760, %v81_v16 }
  0x4a   :  { %6796 = vmatprep.subr.mxu1 %v8202_v4  ;;  %6798 = vmatprep.mubr.f32.mxu1 %v8204_v7  ;;  %v8392_v23 = vand.u32 4294901760, %v8385_v17 }
  0x4b   :  { %6797 = vmatpush3.msra.mxu1 %v8202_v4  ;;  %6801 = vmatprep.subr.mxu0 %v8224_v19  ;;  %9889 = vst [vmem:[#allocation30_spill] sm:$0xff] %v8341_v3  ;;  %v8346_v4 = vand.u32 4294901760, %v737_v63  ;;  %v758_v8 = vsub.f32 %v8319_v61, %v8341_v3  ;;  %v8395_v24 = vsub.f32 %v81_v16, %v8387_v20  ;;  %v77_v63 = vld [vmem:[#allocation5 + $0x10] sm:$0xff] }
  0x4c   :  { %6799 = vmatmul.mubr.f32.vlgmr.msra.gmra.mxu1 %v8208_v10  ;;  %6836 = vmatprep.subr.mxu1 %v8297_v54  ;;  %9894 = vst [vmem:[#allocation35_spill] sm:$0xff] %v8392_v23  ;;  %v765_v28 = vsub.f32 %v8385_v17, %v8392_v23  ;;  %v8435_v12 = vand.u32 4294901760, %v77_v63  ;;  %v8439_v16 = vsub.f32 %v78_v41, %v8424_v59 }
  0x4d   :  { %6837 = vmatpush3.msra.mxu1 %v8297_v54  ;;  %6802 = vmatpush3.msra.mxu0 %v8224_v19  ;;  %9890 = vst [vmem:[#allocation31_spill] sm:$0xff] %v8346_v4  ;;  %v8368_v11 = vand.u32 4294901760, %v758_v8  ;;  %v8404_v29 = vand.u32 4294901760, %v8395_v24  ;;  %v8433_v8 = vand.u32 4294901760, %v8421_v55 }
  0x4e   :  { %6838 = vmatprep.subr.mxu1 %v8311_v58  ;;  %6803 = vmatprep.subr.mxu0 %v8231_v25  ;;  %v8413_v45 = vand.u32 4294901760, %v765_v28  ;;  %v8455_v41 = vand.u32 4294901760, %v8439_v16 }
  0x4f   :  { %6839 = vmatpush3.msra.mxu1 %v8311_v58  ;;  %6804 = vmatpush3.msra.mxu0 %v8231_v25  ;;  %9893 = vst [vmem:[#allocation34_spill] sm:$0xff] %v8368_v11  ;;  %9895 = vst [vmem:[#allocation36_spill] sm:$0xff] %v8404_v29  ;;  %v772_v46 = vsub.f32 %v8395_v24, %v8404_v29  ;;  %v786_v28 = vsub.f32 %v8421_v55, %v8433_v8 }
  0x50   :  { %6840 = vmatprep.subr.mxu1 %v8325_v62  ;;  %6805 = vmatprep.subr.mxu0 %v8240_v32  ;;  %9896 = vst [vmem:[#allocation37_spill] sm:$0xff] %v8413_v45  ;;  %9899 = vst [vmem:[#allocation40_spill] sm:$0xff] %v8433_v8 }
  0x51   :  { %6841 = vmatpush3.msra.mxu1 %v8325_v62  ;;  %6806 = vmatpush3.msra.mxu0 %v8240_v32  ;;  %v8428_v2 = vand.u32 4294901760, %v772_v46  ;;  %v8448_v46 = vsub.f32 %v77_v63, %v8435_v12  ;;  %9901 = vst [vmem:[#allocation42_spill] sm:$0xff] %v8455_v41  ;;  %v8459_v5 = vand.u32 4294901760, %v786_v28 }
  0x52   :  { %6842 = vmatprep.subr.mxu1 %v8335_v1  ;;  %6807 = vmatprep.subr.mxu0 %v8248_v36 }
  0x53   :  { %6843 = vmatpush3.msra.mxu1 %v8335_v1  ;;  %6808 = vmatpush3.msra.mxu0 %v8248_v36  ;;  %9898 = vst [vmem:[#allocation39_spill] sm:$0xff] %v8428_v2  ;;  %9902 = vst [vmem:[#allocation43_spill] sm:$0xff] %v8459_v5 }
  0x54   :  { %6844 = vmatprep.subr.mxu1 %v8346_v4  ;;  %6809 = vmatprep.subr.mxu0 %v8257_v40 }
  0x55   :  { %6845 = vmatpush3.msra.mxu1 %v8346_v4  ;;  %6810 = vmatpush3.msra.mxu0 %v8257_v40 }
  0x56   :  { %6846 = vmatprep.subr.mxu1 %v8354_v6  ;;  %6811 = vmatprep.subr.mxu0 %v8267_v44 }
  0x57   :  { %6847 = vmatpush3.msra.mxu1 %v8354_v6  ;;  %6812 = vmatpush3.msra.mxu0 %v8267_v44 }
  0x58   :  { %6848 = vmatprep.subr.mxu1 %v8362_v9  ;;  %6813 = vmatprep.subr.mxu0 %v8281_v49 }
  0x59   :  { %6849 = vmatpush3.msra.mxu1 %v8362_v9  ;;  %6814 = vmatpush3.msra.mxu0 %v8281_v49  ;;  %v8462_v9 = vand.u32 4294901760, %v8448_v46 }
  0x5a   :  { %6850 = vmatprep.subr.mxu1 %v8368_v11  ;;  %6815 = vmatprep.subr.mxu0 %v8293_v53 }
  0x5b   :  { %6851 = vmatpush3.msra.mxu1 %v8368_v11  ;;  %6816 = vmatpush3.msra.mxu0 %v8293_v53  ;;  %v8450_v11 = vand.u32 4294901760, %v76_v22  ;;  %9903 = vst [vmem:[#allocation44_spill] sm:$0xff] %v8462_v9  ;;  %v800_v28 = vsub.f32 %v8448_v46, %v8462_v9 }
  0x5c   :  { %6817 = vmatprep.subr.mxu0 %v8382_v14  ;;  %6852 = vmatprep.subr.mxu1 %v8413_v45 }
  0x5d   :  { %6818 = vmatpush3.msra.mxu0 %v8382_v14  ;;  %6853 = vmatpush3.msra.mxu1 %v8413_v45  ;;  %v75_v45 = vld [vmem:[#allocation5] sm:$0xff]  ;;  %v8465_v63 = vsub.f32 %v76_v22, %v8450_v11  ;;  %v8488_v1 = vand.u32 4294901760, %v800_v28 }
  0x5e   :  { %6819 = vmatprep.subr.mxu0 %v8387_v20  ;;  %6854 = vmatprep.subr.mxu1 %v8428_v2  ;;  %v8467_v6 = vand.u32 4294901760, %v75_v45 }
  0x5f   :  { %6820 = vmatpush3.msra.mxu0 %v8387_v20  ;;  %6855 = vmatpush3.msra.mxu1 %v8428_v2  ;;  %v793_v2 = vsub.f32 %v8439_v16, %v8455_v41  ;;  %v8478_v4 = vand.u32 4294901760, %v8465_v63  ;;  %9906 = vst [vmem:[#allocation47_spill] sm:$0xff] %v8488_v1 }
  0x60   :  { %6821 = vmatprep.subr.mxu0 %v8397_v26  ;;  %6856 = vmatprep.subr.mxu1 %v8443_v27  ;;  %v8481_v22 = vsub.f32 %v75_v45, %v8467_v6 }
  0x61   :  { %6822 = vmatpush3.msra.mxu0 %v8397_v26  ;;  %6857 = vmatpush3.msra.mxu1 %v8443_v27  ;;  %9904 = vst [vmem:[#allocation45_spill] sm:$0xff] %v8478_v4  ;;  %v8485_v27 = vand.u32 4294901760, %v793_v2  ;;  %v807_v62 = vsub.f32 %v8465_v63, %v8478_v4 }
  0x62   :  { %6823 = vmatprep.subr.mxu0 %v8409_v37  ;;  %6858 = vmatprep.subr.mxu1 %v8459_v5  ;;  %v8493_v58 = vand.u32 4294901760, %v8481_v22 }
  0x63   :  { %6824 = vmatpush3.msra.mxu0 %v8409_v37  ;;  %6859 = vmatpush3.msra.mxu1 %v8459_v5  ;;  %9905 = vst [vmem:[#allocation46_spill] sm:$0xff] %v8485_v27  ;;  %v8499_v45 = vand.u32 4294901760, %v807_v62 }
  0x64   :  { %6825 = vmatprep.subr.mxu0 %v8424_v59  ;;  %9907 = vst [vmem:[#allocation48_spill] sm:$0xff] %v8493_v58  ;;  %6860 = vmatprep.subr.mxu1 %v8485_v27  ;;  %v814_v2 = vsub.f32 %v8481_v22, %v8493_v58 }
  0x65   :  { %6826 = vmatpush3.msra.mxu0 %v8424_v59  ;;  %6861 = vmatpush3.msra.mxu1 %v8485_v27  ;;  %9908 = vst [vmem:[#allocation49_spill] sm:$0xff] %v8499_v45 }
  0x66   :  { %6827 = vmatprep.subr.mxu0 %v8435_v12  ;;  %6862 = vmatprep.subr.mxu1 %v8488_v1  ;;  %v8505_v28 = vand.u32 4294901760, %v814_v2 }
  0x67   :  { %6828 = vmatpush3.msra.mxu0 %v8435_v12  ;;  %6863 = vmatpush3.msra.mxu1 %v8488_v1 }
  0x68   :  { %6829 = vmatprep.subr.mxu0 %v8450_v11  ;;  %9909 = vst [vmem:[#allocation50_spill] sm:$0xff] %v8505_v28  ;;  %6864 = vmatprep.subr.mxu1 %v8499_v45 }
  0x69   :  { %6830 = vmatpush3.msra.mxu0 %v8450_v11  ;;  %6865 = vmatpush3.msra.mxu1 %v8499_v45 }
  0x6a   :  { %6831 = vmatprep.subr.mxu0 %v8467_v6  ;;  %6866 = vmatprep.subr.mxu1 %v8505_v28 }
  0x6b   :  { %6832 = vmatpush3.msra.mxu0 %v8467_v6  ;;  %6867 = vmatpush3.msra.mxu1 %v8505_v28 }
  0x6c   :  { %6871 = vmatprep.subr.mxu0 %v8238_v31  ;;  %6906 = vmatprep.subr.mxu1 %v8224_v19 }
  0xff   :  { %v6765_v62 = vpop.f32.mrf.mxu0 }
 0x100   :  { %v6772_v5 = vpop.f32.mrf.mxu1 }
 0x101   :  { %v175_v27 = vpop.f32.mrf.mxu0  ;;  %v273_v54 = vadd.f32 %v6772_v5, %v6765_v62  ;;  %v9910_v62 = vld [vmem:[#allocation38_spill] sm:$0xff] }
 0x102   :  { %v266_v21 = vpop.f32.mrf.mxu1 }
 0x103   :  { %v267_v15 = vadd.f32 %v266_v21, %v175_v27  ;;  %v6779_v18 = vpop.f32.mrf.mxu0 }
 0x104   :  { %v356_v1 = vadd.f32 %v6779_v18, %v273_v54 }
 0x105   :  { %v348_v2 = vpop.f32.mrf.mxu0 }
 0x106   :  { %v349_v13 = vadd.f32 %v348_v2, %v267_v15  ;;  %v6786_v33 = vpop.f32.mrf.mxu1 }
 0x107   :  { %v439_v30 = vadd.f32 %v6786_v33, %v356_v1  ;;  %v93_v1 = vld [vmem:[#allocation8] sm:$0xff] }
 0x108   :  { %v430_v10 = vpop.f32.mrf.mxu1 }
 0x109   :  { %v431_v45 = vadd.f32 %v430_v10, %v349_v13  ;;  %v6793_v7 = vpop.f32.mrf.mxu0 }
 0x10a   :  { %v522_v58 = vadd.f32 %v6793_v7, %v439_v30 }
 0x10b   :  { %v515_v4 = vpop.f32.mrf.mxu0 }
 0x10c   :  { %v6800_v28 = vpop.f32.mrf.mxu1  ;;  %v516_v9 = vadd.f32 %v515_v4, %v431_v45 }
 0x10d   :  { %v601_v41 = vadd.f32 %v6800_v28, %v522_v58  ;;  %v94_v58 = vld [vmem:[#allocation8 + $0x8] sm:$0xff] }
 0x10e   :  { %v594_v8 = vpop.f32.mrf.mxu1  ;;  %v8614_v4 = vand.u32 4294901760, %v94_v58 }
 0x10f   :  { %v8512_v50 = vand.u32 4294901760, %v601_v41  ;;  %v595_v5 = vadd.f32 %v594_v8, %v516_v9  ;;  %v8620_v9 = vand.u32 4294901760, %v93_v1 }
 0x110   :  { %v1405_v8 = vsub.f32 %v94_v58, %v8614_v4  ;;  %v9919_v58 = vld [vmem:[#allocation22_spill] sm:$0xff] }
 0x111   :  { %v8515_v21 = vsub.f32 %v601_v41, %v8512_v50  ;;  %v8517_v18 = vand.u32 4294901760, %v595_v5  ;;  %v1412_v27 = vsub.f32 %v93_v1, %v8620_v9  ;;  %v9921_v1 = vld [vmem:[#allocation19_spill] sm:$0xff] }
 0x112   :  { %v1406_v41 = vand.u32 4294901760, %v1405_v8 }
 0x113   :  { %v697_v15 = vand.u32 4294901760, %v8515_v21  ;;  %v686_v33 = vsub.f32 %v595_v5, %v8517_v18  ;;  %6868 = vmatprep.mubr.f32.mxu1 %v8517_v18  ;;  %v1413_v45 = vand.u32 4294901760, %v1412_v27  ;;  %v9911_v5 = vld [vmem:[#allocation40_spill] sm:$0xff] }
 0x114   :  { %6869 = vmatmul.mubr.f32.vlgmr.msra.gmra.mxu1 %v8512_v50  ;;  %v1407_v28 = vsub.f32 %v1405_v8, %v1406_v41 }
 0x115   :  { %6907 = vmatpush3.msra.mxu1 %v8224_v19  ;;  %v687_v7 = vand.u32 4294901760, %v686_v33  ;;  %v698_v10 = vsub.f32 %v8515_v21, %v697_v15  ;;  %v1414_v2 = vsub.f32 %v1412_v27, %v1413_v45 }
 0x116   :  { %6908 = vmatprep.subr.mxu1 %v8231_v25 }
 0x117   :  { %6909 = vmatpush3.msra.mxu1 %v8231_v25  ;;  %6938 = vmatprep.mubr.f32.mxu1 %v687_v7  ;;  %v688_v13 = vsub.f32 %v686_v33, %v687_v7  ;;  %v699_v54 = vand.u32 4294901760, %v698_v10  ;;  %v9914_v7 = vld [vmem:[#allocation45_spill] sm:$0xff]  ;;  %v9915_v10 = vld [vmem:[#allocation48_spill] sm:$0xff] }
 0x118   :  { %6910 = vmatprep.subr.mxu1 %v8240_v32 }
 0x119   :  { %6911 = vmatpush3.msra.mxu1 %v8240_v32  ;;  %v689_v30 = vand.u32 4294901760, %v688_v13  ;;  %v9916_v13 = vld [vmem:[#allocation15_spill] sm:$0xff] }
 0x11a   :  { %6912 = vmatprep.subr.mxu1 %v8248_v36 }
 0x11b   :  { %6913 = vmatpush3.msra.mxu1 %v8248_v36  ;;  %6833 = vmatprep.mubr.f32.mxu0 %v689_v30  ;;  %v9917_v30 = vld [vmem:[#allocation16_spill] sm:$0xff] }
 0x11c   :  { %6914 = vmatprep.subr.mxu1 %v8257_v40  ;;  %6834 = vmatmul.mubr.f32.vlgmr.msra.gmra.mxu0 %v699_v54  ;;  %v9918_v54 = vld [vmem:[#allocation21_spill] sm:$0xff] }
 0x11d   :  { %6872 = vmatpush3.msra.mxu0 %v8238_v31  ;;  %6915 = vmatpush3.msra.mxu1 %v8257_v40 }
 0x11e   :  { %6873 = vmatprep.subr.mxu0 %v8246_v35  ;;  %6903 = vmatprep.mubr.f32.mxu0 %v686_v33  ;;  %v9913_v33 = vld [vmem:[#allocation44_spill] sm:$0xff] }
 0x11f   :  { %6916 = vmatprep.subr.mxu1 %v8267_v44  ;;  %6874 = vmatpush3.msra.mxu0 %v8246_v35 }
 0x120   :  { %6917 = vmatpush3.msra.mxu1 %v8267_v44  ;;  %6875 = vmatprep.subr.mxu0 %v8255_v39 }
 0x121   :  { %6918 = vmatprep.subr.mxu1 %v8281_v49  ;;  %6876 = vmatpush3.msra.mxu0 %v8255_v39 }
 0x122   :  { %6919 = vmatpush3.msra.mxu1 %v8281_v49  ;;  %6877 = vmatprep.subr.mxu0 %v8265_v43 }
 0x123   :  { %6920 = vmatprep.subr.mxu1 %v8293_v53  ;;  %6878 = vmatpush3.msra.mxu0 %v8265_v43 }
 0x124   :  { %6921 = vmatpush3.msra.mxu1 %v8293_v53  ;;  %6879 = vmatprep.subr.mxu0 %v8279_v48 }
 0x125   :  { %6922 = vmatprep.subr.mxu1 %v8382_v14  ;;  %6880 = vmatpush3.msra.mxu0 %v8279_v48 }
 0x126   :  { %6923 = vmatpush3.msra.mxu1 %v8382_v14  ;;  %6881 = vmatprep.subr.mxu0 %v8291_v52 }
 0x127   :  { %6924 = vmatprep.subr.mxu1 %v8387_v20  ;;  %6882 = vmatpush3.msra.mxu0 %v8291_v52 }
 0x128   :  { %6925 = vmatpush3.msra.mxu1 %v8387_v20  ;;  %6883 = vmatprep.subr.mxu0 %v8305_v57 }
 0x129   :  { %6926 = vmatprep.subr.mxu1 %v8397_v26  ;;  %6884 = vmatpush3.msra.mxu0 %v8305_v57 }
 0x12a   :  { %6927 = vmatpush3.msra.mxu1 %v8397_v26  ;;  %6885 = vmatprep.subr.mxu0 %v8319_v61 }
 0x12b   :  { %6928 = vmatprep.subr.mxu1 %v8409_v37  ;;  %6886 = vmatpush3.msra.mxu0 %v8319_v61 }
 0x12c   :  { %6929 = vmatpush3.msra.mxu1 %v8409_v37  ;;  %6887 = vmatprep.subr.mxu0 %v8385_v17 }
 0x12d   :  { %6930 = vmatprep.subr.mxu1 %v8424_v59  ;;  %6888 = vmatpush3.msra.mxu0 %v8385_v17 }
 0x12e   :  { %6931 = vmatpush3.msra.mxu1 %v8424_v59  ;;  %6889 = vmatprep.subr.mxu0 %v8395_v24 }
 0x12f   :  { %6932 = vmatprep.subr.mxu1 %v8435_v12  ;;  %6890 = vmatpush3.msra.mxu0 %v8395_v24 }
 0x130   :  { %6933 = vmatpush3.msra.mxu1 %v8435_v12  ;;  %6891 = vmatprep.subr.mxu0 %v8407_v34 }
 0x131   :  { %6934 = vmatprep.subr.mxu1 %v8450_v11  ;;  %6892 = vmatpush3.msra.mxu0 %v8407_v34 }
 0x132   :  { %6935 = vmatpush3.msra.mxu1 %v8450_v11  ;;  %6893 = vmatprep.subr.mxu0 %v8421_v55 }
 0x133   :  { %6936 = vmatprep.subr.mxu1 %v8467_v6  ;;  %6894 = vmatpush3.msra.mxu0 %v8421_v55 }
 0x134   :  { %6937 = vmatpush3.msra.mxu1 %v8467_v6  ;;  %6895 = vmatprep.subr.mxu0 %v8439_v16 }
 0x135   :  { %6939 = vmatmul.mubr.f32.vlgmr.msra.gmra.mxu1 %v697_v15  ;;  %6976 = vmatprep.subr.mxu1 %v8224_v19  ;;  %v1415_v15 = vand.u32 4294901760, %v1414_v2  ;;  %v9923_v2 = vld [vmem:[#allocation20_spill] sm:$0xff] }
 0x136   :  { %6896 = vmatpush3.msra.mxu0 %v8439_v16  ;;  %6977 = vmatpush3.msra.mxu1 %v8224_v19 }
 0x137   :  { %7008 = vmatprep.mubr.f32.mxu1 %v8517_v18  ;;  %6897 = vmatprep.subr.mxu0 %v8448_v46 }
 0x138   :  { %6978 = vmatprep.subr.mxu1 %v8231_v25  ;;  %6898 = vmatpush3.msra.mxu0 %v8448_v46 }
 0x139   :  { %6979 = vmatpush3.msra.mxu1 %v8231_v25  ;;  %6899 = vmatprep.subr.mxu0 %v8465_v63 }
 0x13a   :  { %6980 = vmatprep.subr.mxu1 %v8240_v32  ;;  %6900 = vmatpush3.msra.mxu0 %v8465_v63 }
 0x13b   :  { %6981 = vmatpush3.msra.mxu1 %v8240_v32  ;;  %6901 = vmatprep.subr.mxu0 %v8481_v22 }
 0x13c   :  { %6982 = vmatprep.subr.mxu1 %v8248_v36  ;;  %6902 = vmatpush3.msra.mxu0 %v8481_v22 }
 0x13d   :  { %6983 = vmatpush3.msra.mxu1 %v8248_v36  ;;  %6904 = vmatmul.mubr.f32.vlgmr.msra.gmra.mxu0 %v8515_v21  ;;  %v1408_v21 = vand.u32 4294901760, %v1407_v28  ;;  %v9922_v28 = vld [vmem:[#allocation18_spill] sm:$0xff] }
 0x13e   :  { %6941 = vmatprep.subr.mxu0 %v8252_v38  ;;  %6984 = vmatprep.subr.mxu1 %v8257_v40 }
 0x13f   :  { %6942 = vmatpush3.msra.mxu0 %v8252_v38  ;;  %6973 = vmatprep.mubr.f32.mxu0 %v8517_v18  ;;  %v9912_v18 = vld [vmem:[#allocation42_spill] sm:$0xff] }
 0x140   :  { %6985 = vmatpush3.msra.mxu1 %v8257_v40  ;;  %6943 = vmatprep.subr.mxu0 %v8262_v42 }
 0x141   :  { %6986 = vmatprep.subr.mxu1 %v8267_v44  ;;  %6944 = vmatpush3.msra.mxu0 %v8262_v42 }
 0x142   :  { %6987 = vmatpush3.msra.mxu1 %v8267_v44  ;;  %6945 = vmatprep.subr.mxu0 %v8276_v47 }
 0x143   :  { %6988 = vmatprep.subr.mxu1 %v8281_v49  ;;  %6946 = vmatpush3.msra.mxu0 %v8276_v47 }
 0x144   :  { %6989 = vmatpush3.msra.mxu1 %v8281_v49  ;;  %6947 = vmatprep.subr.mxu0 %v8288_v51 }
 0x145   :  { %6990 = vmatprep.subr.mxu1 %v8293_v53  ;;  %6948 = vmatpush3.msra.mxu0 %v8288_v51 }
 0x146   :  { %6991 = vmatpush3.msra.mxu1 %v8293_v53  ;;  %6949 = vmatprep.subr.mxu0 %v8302_v56 }
 0x147   :  { %6992 = vmatprep.subr.mxu1 %v8382_v14  ;;  %6950 = vmatpush3.msra.mxu0 %v8302_v56 }
 0x148   :  { %6993 = vmatpush3.msra.mxu1 %v8382_v14  ;;  %6951 = vmatprep.subr.mxu0 %v8316_v60 }
 0x149   :  { %6994 = vmatprep.subr.mxu1 %v8387_v20  ;;  %6952 = vmatpush3.msra.mxu0 %v8316_v60 }
 0x14a   :  { %6995 = vmatpush3.msra.mxu1 %v8387_v20  ;;  %6953 = vmatprep.subr.mxu0 %v8330_v0 }
 0x14b   :  { %6996 = vmatprep.subr.mxu1 %v8397_v26  ;;  %6954 = vmatpush3.msra.mxu0 %v8330_v0 }
 0x14c   :  { %6997 = vmatpush3.msra.mxu1 %v8397_v26  ;;  %6955 = vmatprep.subr.mxu0 %v8341_v3 }
 0x14d   :  { %6998 = vmatprep.subr.mxu1 %v8409_v37  ;;  %6956 = vmatpush3.msra.mxu0 %v8341_v3 }
 0x14e   :  { %6999 = vmatpush3.msra.mxu1 %v8409_v37  ;;  %6957 = vmatprep.subr.mxu0 %v8392_v23 }
 0x14f   :  { %7000 = vmatprep.subr.mxu1 %v8424_v59  ;;  %6958 = vmatpush3.msra.mxu0 %v8392_v23 }
 0x150   :  { %7001 = vmatpush3.msra.mxu1 %v8424_v59  ;;  %6959 = vmatprep.subr.mxu0 %v8404_v29 }
 0x151   :  { %7002 = vmatprep.subr.mxu1 %v8435_v12  ;;  %6960 = vmatpush3.msra.mxu0 %v8404_v29 }
 0x152   :  { %7003 = vmatpush3.msra.mxu1 %v8435_v12  ;;  %6961 = vmatprep.subr.mxu0 %v9910_v62 }
 0x153   :  { %7004 = vmatprep.subr.mxu1 %v8450_v11  ;;  %6962 = vmatpush3.msra.mxu0 %v9910_v62 }
 0x154   :  { %7005 = vmatpush3.msra.mxu1 %v8450_v11  ;;  %6963 = vmatprep.subr.mxu0 %v9911_v5 }
 0x155   :  { %7006 = vmatprep.subr.mxu1 %v8467_v6  ;;  %6964 = vmatpush3.msra.mxu0 %v9911_v5 }
 0x156   :  { %7007 = vmatpush3.msra.mxu1 %v8467_v6  ;;  %6965 = vmatprep.subr.mxu0 %v9912_v18 }
 0x157   :  { %7009 = vmatmul.mubr.f32.vlgmr.msra.gmra.mxu1 %v8512_v50  ;;  %6966 = vmatpush3.msra.mxu0 %v9912_v18 }
 0x158   :  { %6967 = vmatprep.subr.mxu0 %v9913_v33  ;;  %7018 = vmatprep.subr.mxu1 %v1408_v21 }
 0x159   :  { %6968 = vmatpush3.msra.mxu0 %v9913_v33  ;;  %7019 = vmatpush3.msra.mxu1 %v1408_v21  ;;  %v9930_v21 = vld [vmem:[#allocation33_spill] sm:$0xff] }
 0x15a   :  { %6969 = vmatprep.subr.mxu0 %v9914_v7  ;;  %7020 = vmatprep.subr.mxu1 %v1415_v15 }
 0x15b   :  { %6970 = vmatpush3.msra.mxu0 %v9914_v7  ;;  %7021 = vmatpush3.msra.mxu1 %v1415_v15  ;;  %v9931_v15 = vld [vmem:[#allocation34_spill] sm:$0xff] }
 0x15c   :  { %6971 = vmatprep.subr.mxu0 %v9915_v10  ;;  %7022 = vmatprep.mubr.f32.mxu1 %v9916_v13 }
 0x15d   :  { %6972 = vmatpush3.msra.mxu0 %v9915_v10  ;;  %7023 = vmatmul.mubr.f32.vlgmr.msra.gmra.mxu1 %v9917_v30 }
 0x15e   :  { %6974 = vmatmul.mubr.f32.vlgmr.msra.gmra.mxu0 %v8512_v50  ;;  %7011 = vmatprep.subr.mxu0 %v8614_v4  ;;  %v9920_v50 = vld [vmem:[#allocation17_spill] sm:$0xff] }
 0x15f   :  { %7012 = vmatpush3.msra.mxu0 %v8614_v4  ;;  %7015 = vmatprep.mubr.f32.mxu0 %v9918_v54 }
 0x160   :  { %7013 = vmatprep.subr.mxu0 %v8620_v9  ;;  %7032 = vmatprep.subr.mxu1 %v8614_v4 }
 0x161   :  { %7014 = vmatpush3.msra.mxu0 %v8620_v9  ;;  %7033 = vmatpush3.msra.mxu1 %v8614_v4 }
 0x162   :  { %7016 = vmatmul.mubr.f32.vlgmr.msra.gmra.mxu0 %v9919_v58  ;;  %7025 = vmatprep.subr.mxu0 %v1405_v8 }
 0x163   :  { %7026 = vmatpush3.msra.mxu0 %v1405_v8  ;;  %7034 = vmatprep.subr.mxu1 %v8620_v9  ;;  %v9924_v8 = vld [vmem:[#allocation23_spill] sm:$0xff] }
 0x164   :  { %7027 = vmatprep.subr.mxu0 %v1412_v27  ;;  %7029 = vmatprep.mubr.f32.mxu0 %v9920_v50 }
 0x165   :  { %7028 = vmatpush3.msra.mxu0 %v1412_v27  ;;  %7035 = vmatpush3.msra.mxu1 %v8620_v9  ;;  %v9927_v27 = vld [vmem:[#allocation29_spill] sm:$0xff] }
 0x166   :  { %7036 = vmatprep.mubr.f32.mxu1 %v9921_v1  ;;  %7030 = vmatmul.mubr.f32.vlgmr.msra.gmra.mxu0 %v9922_v28 }
 0x167   :  { %7037 = vmatmul.mubr.f32.vlgmr.msra.gmra.mxu1 %v9923_v2  ;;  %7039 = vmatprep.subr.mxu0 %v1406_v41 }
 0x168   :  { %7046 = vmatprep.subr.mxu1 %v8614_v4  ;;  %7040 = vmatpush3.msra.mxu0 %v1406_v41  ;;  %v9928_v41 = vld [vmem:[#allocation31_spill] sm:$0xff] }
 0x169   :  { %7047 = vmatpush3.msra.mxu1 %v8614_v4  ;;  %7041 = vmatprep.subr.mxu0 %v1413_v45  ;;  %v9925_v4 = vld [vmem:[#allocation25_spill] sm:$0xff] }
 0x16a   :  { %7048 = vmatprep.subr.mxu1 %v8620_v9  ;;  %7042 = vmatpush3.msra.mxu0 %v1413_v45  ;;  %v9929_v45 = vld [vmem:[#allocation32_spill] sm:$0xff] }
 0x16b   :  { %7043 = vmatprep.mubr.f32.mxu0 %v9916_v13  ;;  %7049 = vmatpush3.msra.mxu1 %v8620_v9  ;;  %v9926_v9 = vld [vmem:[#allocation27_spill] sm:$0xff] }
 0x16c   :  { %7050 = vmatprep.mubr.f32.mxu1 %v9916_v13  ;;  %7044 = vmatmul.mubr.f32.vlgmr.msra.gmra.mxu0 %v9917_v30 }
 0x16d   :  { %7051 = vmatmul.mubr.f32.vlgmr.msra.gmra.mxu1 %v9917_v30  ;;  %7088 = vmatprep.subr.mxu1 %v9924_v8 }
 0x16e   :  { %7089 = vmatpush3.msra.mxu1 %v9924_v8  ;;  %7053 = vmatprep.subr.mxu0 %v8224_v19 }
 0x16f   :  { %7090 = vmatprep.subr.mxu1 %v9925_v4  ;;  %7054 = vmatpush3.msra.mxu0 %v8224_v19 }
 0x170   :  { %7091 = vmatpush3.msra.mxu1 %v9925_v4  ;;  %7055 = vmatprep.subr.mxu0 %v8231_v25 }
 0x171   :  { %7092 = vmatprep.subr.mxu1 %v9926_v9  ;;  %7056 = vmatpush3.msra.mxu0 %v8231_v25 }
 0x172   :  { %7093 = vmatpush3.msra.mxu1 %v9926_v9  ;;  %7057 = vmatprep.subr.mxu0 %v8240_v32 }
 0x173   :  { %7094 = vmatprep.subr.mxu1 %v9927_v27  ;;  %7058 = vmatpush3.msra.mxu0 %v8240_v32 }
 0x174   :  { %7095 = vmatpush3.msra.mxu1 %v9927_v27  ;;  %7059 = vmatprep.subr.mxu0 %v8248_v36 }
 0x175   :  { %7096 = vmatprep.subr.mxu1 %v9928_v41  ;;  %7060 = vmatpush3.msra.mxu0 %v8248_v36 }
 0x176   :  { %7097 = vmatpush3.msra.mxu1 %v9928_v41  ;;  %7061 = vmatprep.subr.mxu0 %v8257_v40  ;;  %v9932_v41 = vld [vmem:[#allocation37_spill] sm:$0xff] }
 0x177   :  { %7098 = vmatprep.subr.mxu1 %v9929_v45  ;;  %7062 = vmatpush3.msra.mxu0 %v8257_v40 }
 0x178   :  { %7099 = vmatpush3.msra.mxu1 %v9929_v45  ;;  %7063 = vmatprep.subr.mxu0 %v8267_v44  ;;  %v9933_v45 = vld [vmem:[#allocation39_spill] sm:$0xff] }
 0x179   :  { %7100 = vmatprep.subr.mxu1 %v9930_v21  ;;  %7064 = vmatpush3.msra.mxu0 %v8267_v44 }
 0x17a   :  { %7101 = vmatpush3.msra.mxu1 %v9930_v21  ;;  %7065 = vmatprep.subr.mxu0 %v8281_v49  ;;  %v9934_v21 = vld [vmem:[#allocation41_spill] sm:$0xff] }
 0x17b   :  { %7102 = vmatprep.subr.mxu1 %v9931_v15  ;;  %7066 = vmatpush3.msra.mxu0 %v8281_v49 }
 0x17c   :  { %7103 = vmatpush3.msra.mxu1 %v9931_v15  ;;  %7067 = vmatprep.subr.mxu0 %v8293_v53  ;;  %v9935_v15 = vld [vmem:[#allocation43_spill] sm:$0xff] }
 0x17d   :  { %7104 = vmatprep.subr.mxu1 %v9932_v41  ;;  %7068 = vmatpush3.msra.mxu0 %v8293_v53 }
 0x17e   :  { %7105 = vmatpush3.msra.mxu1 %v9932_v41  ;;  %7069 = vmatprep.subr.mxu0 %v8382_v14  ;;  %v9936_v41 = vld [vmem:[#allocation46_spill] sm:$0xff] }
 0x17f   :  { %7106 = vmatprep.subr.mxu1 %v9933_v45  ;;  %7070 = vmatpush3.msra.mxu0 %v8382_v14 }
 0x180   :  { %7107 = vmatpush3.msra.mxu1 %v9933_v45  ;;  %7071 = vmatprep.subr.mxu0 %v8387_v20  ;;  %v9937_v45 = vld [vmem:[#allocation47_spill] sm:$0xff] }
 0x181   :  { %7108 = vmatprep.subr.mxu1 %v9934_v21  ;;  %7072 = vmatpush3.msra.mxu0 %v8387_v20 }
 0x182   :  { %7109 = vmatpush3.msra.mxu1 %v9934_v21  ;;  %7073 = vmatprep.subr.mxu0 %v8397_v26  ;;  %v9938_v21 = vld [vmem:[#allocation49_spill] sm:$0xff] }
 0x183   :  { %7110 = vmatprep.subr.mxu1 %v9935_v15  ;;  %7074 = vmatpush3.msra.mxu0 %v8397_v26 }
 0x184   :  { %7111 = vmatpush3.msra.mxu1 %v9935_v15  ;;  %7075 = vmatprep.subr.mxu0 %v8409_v37  ;;  %v9939_v15 = vld [vmem:[#allocation50_spill] sm:$0xff] }
 0x185   :  { %7112 = vmatprep.subr.mxu1 %v9936_v41  ;;  %7076 = vmatpush3.msra.mxu0 %v8409_v37 }
 0x186   :  { %7113 = vmatpush3.msra.mxu1 %v9936_v41  ;;  %7077 = vmatprep.subr.mxu0 %v8424_v59 }
 0x187   :  { %7114 = vmatprep.subr.mxu1 %v9937_v45  ;;  %7078 = vmatpush3.msra.mxu0 %v8424_v59 }
 0x188   :  { %7115 = vmatpush3.msra.mxu1 %v9937_v45  ;;  %7079 = vmatprep.subr.mxu0 %v8435_v12 }
 0x189   :  { %7116 = vmatprep.subr.mxu1 %v9938_v21  ;;  %7080 = vmatpush3.msra.mxu0 %v8435_v12 }
 0x18a   :  { %7117 = vmatpush3.msra.mxu1 %v9938_v21  ;;  %7081 = vmatprep.subr.mxu0 %v8450_v11 }
 0x18b   :  { %7118 = vmatprep.subr.mxu1 %v9939_v15  ;;  %7082 = vmatpush3.msra.mxu0 %v8450_v11 }
 0x18c   :  { %7119 = vmatpush3.msra.mxu1 %v9939_v15  ;;  %7083 = vmatprep.subr.mxu0 %v8467_v6 }
 0x18d   :  { %7158 = vmatprep.subr.mxu1 %v8224_v19  ;;  %7084 = vmatpush3.msra.mxu0 %v8467_v6 }
 0x18e   :  { %7123 = vmatprep.subr.mxu0 %v8238_v31 }
 0x1d4   :  { %v6870_v45 = vpop.f32.mrf.mxu1 }
 0x1d6   :  { %v852_v21 = vpop.f32.mrf.mxu1 }
 0x1dc   :  { %v6835_v41 = vpop.f32.mrf.mxu0 }
 0x1dd   :  { %v859_v27 = vadd.f32 %v6870_v45, %v6835_v41 }
 0x1de   :  { %v691_v9 = vpop.f32.mrf.mxu0 }
 0x1df   :  { %v853_v4 = vadd.f32 %v852_v21, %v691_v9 }
 0x1f5   :  { %v6940_v8 = vpop.f32.mrf.mxu1 }
 0x1f7   :  { %v1058_v58 = vpop.f32.mrf.mxu1 }
 0x1fd   :  { %v6905_v2 = vpop.f32.mrf.mxu0 }
 0x1fe   :  { %v970_v28 = vadd.f32 %v6905_v2, %v859_v27 }
 0x1ff   :  { %v962_v1 = vpop.f32.mrf.mxu0 }
 0x200   :  { %v963_v50 = vadd.f32 %v962_v1, %v853_v4  ;;  %v1067_v15 = vadd.f32 %v6940_v8, %v970_v28 }
 0x202   :  { %v1059_v54 = vadd.f32 %v1058_v58, %v963_v50 }
 0x217   :  { %v7010_v30 = vpop.f32.mrf.mxu1 }
 0x219   :  { %v1278_v13 = vpop.f32.mrf.mxu1 }
 0x21d   :  { %v7024_v33 = vpop.f32.mrf.mxu1 }
 0x21e   :  { %v6975_v10 = vpop.f32.mrf.mxu0 }
 0x21f   :  { %v1192_v7 = vadd.f32 %v6975_v10, %v1067_v15  ;;  %v1452_v9 = vpop.f32.mrf.mxu1 }
 0x220   :  { %v1185_v18 = vpop.f32.mrf.mxu0 }
 0x221   :  { %v8755_v5 = vadd.f32 %v7010_v30, %v1192_v7  ;;  %v1186_v41 = vadd.f32 %v1185_v18, %v1059_v54 }
 0x222   :  { %v7017_v45 = vpop.f32.mrf.mxu0 }
 0x223   :  { %v8757_v62 = vadd.f32 %v1278_v13, %v1186_v41  ;;  %v1459_v2 = vadd.f32 %v7024_v33, %v7017_v45 }
 0x224   :  { %v1361_v21 = vpop.f32.mrf.mxu0 }
 0x225   :  { %9940 = vst [vmem:[#allocation51_spill] sm:$0xff] %v8757_v62  ;;  %v1453_v1 = vadd.f32 %v1452_v9, %v1361_v21 }
 0x226   :  { %v7031_v27 = vpop.f32.mrf.mxu0 }
 0x227   :  { %v1542_v28 = vadd.f32 %v7031_v27, %v1459_v2  ;;  %v7038_v8 = vpop.f32.mrf.mxu1 }
 0x228   :  { %v1534_v58 = vpop.f32.mrf.mxu0 }
 0x229   :  { %v1625_v50 = vadd.f32 %v7038_v8, %v1542_v28  ;;  %v1535_v4 = vadd.f32 %v1534_v58, %v1453_v1  ;;  %v1616_v29 = vpop.f32.mrf.mxu1  ;;  %v8030_v1 = vld [vmem:[#allocation7 + $0x8] sm:$0xff]  ;;  %v8031_v8 = vld [vmem:[#allocation7] sm:$0xff] }
 0x22a   :  { %v2481_v28 = vmul.f32 %v8030_v1, %v8030_v1  ;;  %v2480_v58 = vmul.f32 %v8031_v8, %v8031_v8  ;;  %v9949_v1 = vld [vmem:[#allocation15_spill] sm:$0xff]  ;;  %v9951_v8 = vld [vmem:[#allocation21_spill] sm:$0xff] }
 0x22b   :  { %v1617_v10 = vadd.f32 %v1616_v29, %v1535_v4 }
 0x22c   :  { %v7045_v15 = vpop.f32.mrf.mxu0  ;;  %v8867_v4 = vand.u32 4294901760, %v2480_v58 }
 0x22d   :  { %v1708_v23 = vadd.f32 %v7045_v15, %v1625_v50  ;;  %v7052_v7 = vpop.f32.mrf.mxu1  ;;  %v8861_v50 = vand.u32 4294901760, %v2481_v28 }
 0x22e   :  { %v1701_v30 = vpop.f32.mrf.mxu0  ;;  %v2606_v15 = vsub.f32 %v2480_v58, %v8867_v4  ;;  %v9952_v58 = vld [vmem:[#allocation22_spill] sm:$0xff] }
 0x22f   :  { %v1787_v18 = vadd.f32 %v7052_v7, %v1708_v23  ;;  %v1702_v54 = vadd.f32 %v1701_v30, %v1617_v10  ;;  %v1780_v13 = vpop.f32.mrf.mxu1  ;;  %v2599_v10 = vsub.f32 %v2481_v28, %v8861_v50  ;;  %v9941_v30 = vld [vmem:[#allocation35_spill] sm:$0xff]  ;;  %v9950_v28 = vld [vmem:[#allocation16_spill] sm:$0xff] }
 0x231   :  { %v8759_v41 = vand.u32 4294901760, %v1787_v18  ;;  %v1781_v62 = vadd.f32 %v1780_v13, %v1702_v54  ;;  %v2600_v7 = vand.u32 4294901760, %v2599_v10  ;;  %v9942_v54 = vld [vmem:[#allocation36_spill] sm:$0xff] }
 0x233   :  { %v8762_v33 = vsub.f32 %v1787_v18, %v8759_v41  ;;  %v8764_v45 = vand.u32 4294901760, %v1781_v62  ;;  %v2607_v18 = vand.u32 4294901760, %v2606_v15  ;;  %v2601_v13 = vsub.f32 %v2599_v10, %v2600_v7 }
 0x235   :  { %v1883_v9 = vand.u32 4294901760, %v8762_v33  ;;  %v1872_v21 = vsub.f32 %v1781_v62, %v8764_v45  ;;  %7120 = vmatprep.mubr.f32.mxu1 %v8764_v45 }
 0x236   :  { %7121 = vmatmul.mubr.f32.vlgmr.msra.gmra.mxu1 %v8759_v41 }
 0x237   :  { %7159 = vmatpush3.msra.mxu1 %v8224_v19  ;;  %v1873_v23 = vand.u32 4294901760, %v1872_v21  ;;  %v1884_v29 = vsub.f32 %v8762_v33, %v1883_v9 }
 0x238   :  { %7160 = vmatprep.subr.mxu1 %v8231_v25 }
 0x239   :  { %7161 = vmatpush3.msra.mxu1 %v8231_v25  ;;  %7190 = vmatprep.mubr.f32.mxu1 %v1873_v23  ;;  %v1874_v2 = vsub.f32 %v1872_v21, %v1873_v23  ;;  %v1885_v27 = vand.u32 4294901760, %v1884_v29  ;;  %v9945_v23 = vld [vmem:[#allocation42_spill] sm:$0xff] }
 0x23a   :  { %7162 = vmatprep.subr.mxu1 %v8240_v32 }
 0x23b   :  { %7163 = vmatpush3.msra.mxu1 %v8240_v32  ;;  %v1875_v62 = vand.u32 4294901760, %v1874_v2  ;;  %v9946_v2 = vld [vmem:[#allocation44_spill] sm:$0xff] }
 0x23c   :  { %7164 = vmatprep.subr.mxu1 %v8248_v36 }
 0x23d   :  { %7165 = vmatpush3.msra.mxu1 %v8248_v36  ;;  %7085 = vmatprep.mubr.f32.mxu0 %v1875_v62  ;;  %v9947_v62 = vld [vmem:[#allocation45_spill] sm:$0xff] }
 0x23e   :  { %7166 = vmatprep.subr.mxu1 %v8257_v40  ;;  %7086 = vmatmul.mubr.f32.vlgmr.msra.gmra.mxu0 %v1885_v27  ;;  %v9948_v27 = vld [vmem:[#allocation48_spill] sm:$0xff] }
 0x23f   :  { %7124 = vmatpush3.msra.mxu0 %v8238_v31  ;;  %7167 = vmatpush3.msra.mxu1 %v8257_v40 }
 0x240   :  { %7125 = vmatprep.subr.mxu0 %v8246_v35  ;;  %7155 = vmatprep.mubr.f32.mxu0 %v1872_v21  ;;  %v2602_v21 = vand.u32 4294901760, %v2601_v13  ;;  %v9954_v13 = vld [vmem:[#allocation19_spill] sm:$0xff] }
 0x241   :  { %7168 = vmatprep.subr.mxu1 %v8267_v44  ;;  %7126 = vmatpush3.msra.mxu0 %v8246_v35 }
 0x242   :  { %7169 = vmatpush3.msra.mxu1 %v8267_v44  ;;  %7127 = vmatprep.subr.mxu0 %v8255_v39 }
 0x243   :  { %7170 = vmatprep.subr.mxu1 %v8281_v49  ;;  %7128 = vmatpush3.msra.mxu0 %v8255_v39 }
 0x244   :  { %7171 = vmatpush3.msra.mxu1 %v8281_v49  ;;  %7129 = vmatprep.subr.mxu0 %v8265_v43 }
 0x245   :  { %7172 = vmatprep.subr.mxu1 %v8293_v53  ;;  %7130 = vmatpush3.msra.mxu0 %v8265_v43 }
 0x246   :  { %7173 = vmatpush3.msra.mxu1 %v8293_v53  ;;  %7131 = vmatprep.subr.mxu0 %v8279_v48 }
 0x247   :  { %7174 = vmatprep.subr.mxu1 %v8382_v14  ;;  %7132 = vmatpush3.msra.mxu0 %v8279_v48 }
 0x248   :  { %7175 = vmatpush3.msra.mxu1 %v8382_v14  ;;  %7133 = vmatprep.subr.mxu0 %v8291_v52 }
 0x249   :  { %7176 = vmatprep.subr.mxu1 %v8387_v20  ;;  %7134 = vmatpush3.msra.mxu0 %v8291_v52 }
 0x24a   :  { %7177 = vmatpush3.msra.mxu1 %v8387_v20  ;;  %7135 = vmatprep.subr.mxu0 %v8305_v57 }
 0x24b   :  { %7178 = vmatprep.subr.mxu1 %v8397_v26  ;;  %7136 = vmatpush3.msra.mxu0 %v8305_v57 }
 0x24c   :  { %7179 = vmatpush3.msra.mxu1 %v8397_v26  ;;  %7137 = vmatprep.subr.mxu0 %v8319_v61 }
 0x24d   :  { %7180 = vmatprep.subr.mxu1 %v8409_v37  ;;  %7138 = vmatpush3.msra.mxu0 %v8319_v61 }
 0x24e   :  { %7181 = vmatpush3.msra.mxu1 %v8409_v37  ;;  %7139 = vmatprep.subr.mxu0 %v8385_v17 }
 0x24f   :  { %7182 = vmatprep.subr.mxu1 %v8424_v59  ;;  %7140 = vmatpush3.msra.mxu0 %v8385_v17 }
 0x250   :  { %7183 = vmatpush3.msra.mxu1 %v8424_v59  ;;  %7141 = vmatprep.subr.mxu0 %v8395_v24 }
 0x251   :  { %7184 = vmatprep.subr.mxu1 %v8435_v12  ;;  %7142 = vmatpush3.msra.mxu0 %v8395_v24 }
 0x252   :  { %7185 = vmatpush3.msra.mxu1 %v8435_v12  ;;  %7143 = vmatprep.subr.mxu0 %v8407_v34 }
 0x253   :  { %7186 = vmatprep.subr.mxu1 %v8450_v11  ;;  %7144 = vmatpush3.msra.mxu0 %v8407_v34 }
 0x254   :  { %7187 = vmatpush3.msra.mxu1 %v8450_v11  ;;  %7145 = vmatprep.subr.mxu0 %v8421_v55 }
 0x255   :  { %7188 = vmatprep.subr.mxu1 %v8467_v6  ;;  %7146 = vmatpush3.msra.mxu0 %v8421_v55 }
 0x256   :  { %7189 = vmatpush3.msra.mxu1 %v8467_v6  ;;  %7147 = vmatprep.subr.mxu0 %v8439_v16 }
 0x257   :  { %7191 = vmatmul.mubr.f32.vlgmr.msra.gmra.mxu1 %v1883_v9  ;;  %7228 = vmatprep.subr.mxu1 %v8224_v19  ;;  %v9944_v9 = vld [vmem:[#allocation40_spill] sm:$0xff] }
 0x258   :  { %7148 = vmatpush3.msra.mxu0 %v8439_v16  ;;  %7229 = vmatpush3.msra.mxu1 %v8224_v19 }
 0x259   :  { %7260 = vmatprep.mubr.f32.mxu1 %v8764_v45  ;;  %7149 = vmatprep.subr.mxu0 %v8448_v46 }
 0x25a   :  { %7230 = vmatprep.subr.mxu1 %v8231_v25  ;;  %7150 = vmatpush3.msra.mxu0 %v8448_v46 }
 0x25b   :  { %7231 = vmatpush3.msra.mxu1 %v8231_v25  ;;  %7151 = vmatprep.subr.mxu0 %v8465_v63 }
 0x25c   :  { %7232 = vmatprep.subr.mxu1 %v8240_v32  ;;  %7152 = vmatpush3.msra.mxu0 %v8465_v63 }
 0x25d   :  { %7233 = vmatpush3.msra.mxu1 %v8240_v32  ;;  %7153 = vmatprep.subr.mxu0 %v8481_v22 }
 0x25e   :  { %7234 = vmatprep.subr.mxu1 %v8248_v36  ;;  %7154 = vmatpush3.msra.mxu0 %v8481_v22 }
 0x25f   :  { %7235 = vmatpush3.msra.mxu1 %v8248_v36  ;;  %7156 = vmatmul.mubr.f32.vlgmr.msra.gmra.mxu0 %v8762_v33  ;;  %v9943_v33 = vld [vmem:[#allocation38_spill] sm:$0xff] }
 0x260   :  { %7193 = vmatprep.subr.mxu0 %v8252_v38  ;;  %7236 = vmatprep.subr.mxu1 %v8257_v40 }
 0x261   :  { %7194 = vmatpush3.msra.mxu0 %v8252_v38  ;;  %7225 = vmatprep.mubr.f32.mxu0 %v8764_v45  ;;  %v2608_v45 = vsub.f32 %v2606_v15, %v2607_v18 }
 0x262   :  { %7237 = vmatpush3.msra.mxu1 %v8257_v40  ;;  %7195 = vmatprep.subr.mxu0 %v8262_v42 }
 0x263   :  { %7238 = vmatprep.subr.mxu1 %v8267_v44  ;;  %7196 = vmatpush3.msra.mxu0 %v8262_v42  ;;  %v2609_v29 = vand.u32 4294901760, %v2608_v45  ;;  %v9955_v45 = vld [vmem:[#allocation18_spill] sm:$0xff] }
 0x264   :  { %7239 = vmatpush3.msra.mxu1 %v8267_v44  ;;  %7197 = vmatprep.subr.mxu0 %v8276_v47 }
 0x265   :  { %7240 = vmatprep.subr.mxu1 %v8281_v49  ;;  %7198 = vmatpush3.msra.mxu0 %v8276_v47 }
 0x266   :  { %7241 = vmatpush3.msra.mxu1 %v8281_v49  ;;  %7199 = vmatprep.subr.mxu0 %v8288_v51 }
 0x267   :  { %7242 = vmatprep.subr.mxu1 %v8293_v53  ;;  %7200 = vmatpush3.msra.mxu0 %v8288_v51 }
 0x268   :  { %7243 = vmatpush3.msra.mxu1 %v8293_v53  ;;  %7201 = vmatprep.subr.mxu0 %v8302_v56 }
 0x269   :  { %7244 = vmatprep.subr.mxu1 %v8382_v14  ;;  %7202 = vmatpush3.msra.mxu0 %v8302_v56 }
 0x26a   :  { %7245 = vmatpush3.msra.mxu1 %v8382_v14  ;;  %7203 = vmatprep.subr.mxu0 %v8316_v60 }
 0x26b   :  { %7246 = vmatprep.subr.mxu1 %v8387_v20  ;;  %7204 = vmatpush3.msra.mxu0 %v8316_v60 }
 0x26c   :  { %7247 = vmatpush3.msra.mxu1 %v8387_v20  ;;  %7205 = vmatprep.subr.mxu0 %v8330_v0 }
 0x26d   :  { %7248 = vmatprep.subr.mxu1 %v8397_v26  ;;  %7206 = vmatpush3.msra.mxu0 %v8330_v0 }
 0x26e   :  { %7249 = vmatpush3.msra.mxu1 %v8397_v26  ;;  %7207 = vmatprep.subr.mxu0 %v8341_v3 }
 0x26f   :  { %7250 = vmatprep.subr.mxu1 %v8409_v37  ;;  %7208 = vmatpush3.msra.mxu0 %v8341_v3 }
 0x270   :  { %7251 = vmatpush3.msra.mxu1 %v8409_v37  ;;  %7209 = vmatprep.subr.mxu0 %v9941_v30 }
 0x271   :  { %7252 = vmatprep.subr.mxu1 %v8424_v59  ;;  %7210 = vmatpush3.msra.mxu0 %v9941_v30 }
 0x272   :  { %7253 = vmatpush3.msra.mxu1 %v8424_v59  ;;  %7211 = vmatprep.subr.mxu0 %v9942_v54 }
 0x273   :  { %7254 = vmatprep.subr.mxu1 %v8435_v12  ;;  %7212 = vmatpush3.msra.mxu0 %v9942_v54 }
 0x274   :  { %7255 = vmatpush3.msra.mxu1 %v8435_v12  ;;  %7213 = vmatprep.subr.mxu0 %v9943_v33 }
 0x275   :  { %7256 = vmatprep.subr.mxu1 %v8450_v11  ;;  %7214 = vmatpush3.msra.mxu0 %v9943_v33 }
 0x276   :  { %7257 = vmatpush3.msra.mxu1 %v8450_v11  ;;  %7215 = vmatprep.subr.mxu0 %v9944_v9 }
 0x277   :  { %7258 = vmatprep.subr.mxu1 %v8467_v6  ;;  %7216 = vmatpush3.msra.mxu0 %v9944_v9 }
 0x278   :  { %7259 = vmatpush3.msra.mxu1 %v8467_v6  ;;  %7217 = vmatprep.subr.mxu0 %v9945_v23 }
 0x279   :  { %7261 = vmatmul.mubr.f32.vlgmr.msra.gmra.mxu1 %v8759_v41  ;;  %7218 = vmatpush3.msra.mxu0 %v9945_v23 }
 0x27a   :  { %7219 = vmatprep.subr.mxu0 %v9946_v2  ;;  %7270 = vmatprep.subr.mxu1 %v2602_v21 }
 0x27b   :  { %7220 = vmatpush3.msra.mxu0 %v9946_v2  ;;  %7271 = vmatpush3.msra.mxu1 %v2602_v21  ;;  %v9956_v21 = vld [vmem:[#allocation20_spill] sm:$0xff] }
 0x27c   :  { %7221 = vmatprep.subr.mxu0 %v9947_v62  ;;  %7272 = vmatprep.subr.mxu1 %v2609_v29 }
 0x27d   :  { %7222 = vmatpush3.msra.mxu0 %v9947_v62  ;;  %7273 = vmatpush3.msra.mxu1 %v2609_v29  ;;  %v9963_v29 = vld [vmem:[#allocation33_spill] sm:$0xff] }
 0x27e   :  { %7223 = vmatprep.subr.mxu0 %v9948_v27  ;;  %7274 = vmatprep.mubr.f32.mxu1 %v9949_v1 }
 0x27f   :  { %7224 = vmatpush3.msra.mxu0 %v9948_v27  ;;  %7275 = vmatmul.mubr.f32.vlgmr.msra.gmra.mxu1 %v9950_v28 }
 0x280   :  { %7226 = vmatmul.mubr.f32.vlgmr.msra.gmra.mxu0 %v8759_v41  ;;  %7263 = vmatprep.subr.mxu0 %v8861_v50  ;;  %v9953_v41 = vld [vmem:[#allocation17_spill] sm:$0xff] }
 0x281   :  { %7264 = vmatpush3.msra.mxu0 %v8861_v50  ;;  %7267 = vmatprep.mubr.f32.mxu0 %v9951_v8 }
 0x282   :  { %7265 = vmatprep.subr.mxu0 %v8867_v4  ;;  %7284 = vmatprep.subr.mxu1 %v8861_v50 }
 0x283   :  { %7266 = vmatpush3.msra.mxu0 %v8867_v4  ;;  %7285 = vmatpush3.msra.mxu1 %v8861_v50 }
 0x284   :  { %7268 = vmatmul.mubr.f32.vlgmr.msra.gmra.mxu0 %v9952_v58  ;;  %7277 = vmatprep.subr.mxu0 %v2599_v10 }
 0x285   :  { %7278 = vmatpush3.msra.mxu0 %v2599_v10  ;;  %7286 = vmatprep.subr.mxu1 %v8867_v4  ;;  %v9957_v10 = vld [vmem:[#allocation23_spill] sm:$0xff] }
 0x286   :  { %7279 = vmatprep.subr.mxu0 %v2606_v15  ;;  %7281 = vmatprep.mubr.f32.mxu0 %v9953_v41 }
 0x287   :  { %7280 = vmatpush3.msra.mxu0 %v2606_v15  ;;  %7287 = vmatpush3.msra.mxu1 %v8867_v4  ;;  %v9960_v15 = vld [vmem:[#allocation29_spill] sm:$0xff] }
 0x288   :  { %7288 = vmatprep.mubr.f32.mxu1 %v9954_v13  ;;  %7282 = vmatmul.mubr.f32.vlgmr.msra.gmra.mxu0 %v9955_v45 }
 0x289   :  { %7289 = vmatmul.mubr.f32.vlgmr.msra.gmra.mxu1 %v9956_v21  ;;  %7291 = vmatprep.subr.mxu0 %v2600_v7 }
 0x28a   :  { %7298 = vmatprep.subr.mxu1 %v8861_v50  ;;  %7292 = vmatpush3.msra.mxu0 %v2600_v7  ;;  %v9961_v7 = vld [vmem:[#allocation31_spill] sm:$0xff] }
 0x28b   :  { %7299 = vmatpush3.msra.mxu1 %v8861_v50  ;;  %7293 = vmatprep.subr.mxu0 %v2607_v18  ;;  %v9958_v50 = vld [vmem:[#allocation25_spill] sm:$0xff] }
 0x28c   :  { %7300 = vmatprep.subr.mxu1 %v8867_v4  ;;  %7294 = vmatpush3.msra.mxu0 %v2607_v18  ;;  %v9962_v18 = vld [vmem:[#allocation32_spill] sm:$0xff] }
 0x28d   :  { %7295 = vmatprep.mubr.f32.mxu0 %v9949_v1  ;;  %7301 = vmatpush3.msra.mxu1 %v8867_v4  ;;  %v9959_v4 = vld [vmem:[#allocation27_spill] sm:$0xff] }
 0x28e   :  { %7302 = vmatprep.mubr.f32.mxu1 %v9949_v1  ;;  %7296 = vmatmul.mubr.f32.vlgmr.msra.gmra.mxu0 %v9950_v28 }
 0x28f   :  { %7303 = vmatmul.mubr.f32.vlgmr.msra.gmra.mxu1 %v9950_v28  ;;  %7340 = vmatprep.subr.mxu1 %v9957_v10 }
 0x290   :  { %7341 = vmatpush3.msra.mxu1 %v9957_v10  ;;  %7305 = vmatprep.subr.mxu0 %v8224_v19 }
 0x291   :  { %7342 = vmatprep.subr.mxu1 %v9958_v50  ;;  %7306 = vmatpush3.msra.mxu0 %v8224_v19 }
 0x292   :  { %7343 = vmatpush3.msra.mxu1 %v9958_v50  ;;  %7307 = vmatprep.subr.mxu0 %v8231_v25 }
 0x293   :  { %7344 = vmatprep.subr.mxu1 %v9959_v4  ;;  %7308 = vmatpush3.msra.mxu0 %v8231_v25 }
 0x294   :  { %7345 = vmatpush3.msra.mxu1 %v9959_v4  ;;  %7309 = vmatprep.subr.mxu0 %v8240_v32 }
 0x295   :  { %7346 = vmatprep.subr.mxu1 %v9960_v15  ;;  %7310 = vmatpush3.msra.mxu0 %v8240_v32 }
 0x296   :  { %7347 = vmatpush3.msra.mxu1 %v9960_v15  ;;  %7311 = vmatprep.subr.mxu0 %v8248_v36  ;;  %v9964_v15 = vld [vmem:[#allocation34_spill] sm:$0xff] }
 0x297   :  { %7348 = vmatprep.subr.mxu1 %v9961_v7  ;;  %7312 = vmatpush3.msra.mxu0 %v8248_v36 }
 0x298   :  { %7349 = vmatpush3.msra.mxu1 %v9961_v7  ;;  %7313 = vmatprep.subr.mxu0 %v8257_v40  ;;  %v9965_v7 = vld [vmem:[#allocation37_spill] sm:$0xff] }
 0x299   :  { %7350 = vmatprep.subr.mxu1 %v9962_v18  ;;  %7314 = vmatpush3.msra.mxu0 %v8257_v40 }
 0x29a   :  { %7351 = vmatpush3.msra.mxu1 %v9962_v18  ;;  %7315 = vmatprep.subr.mxu0 %v8267_v44  ;;  %v9966_v18 = vld [vmem:[#allocation39_spill] sm:$0xff] }
 0x29b   :  { %7352 = vmatprep.subr.mxu1 %v9963_v29  ;;  %7316 = vmatpush3.msra.mxu0 %v8267_v44 }
 0x29c   :  { %7353 = vmatpush3.msra.mxu1 %v9963_v29  ;;  %7317 = vmatprep.subr.mxu0 %v8281_v49  ;;  %v9967_v29 = vld [vmem:[#allocation41_spill] sm:$0xff] }
 0x29d   :  { %7354 = vmatprep.subr.mxu1 %v9964_v15  ;;  %7318 = vmatpush3.msra.mxu0 %v8281_v49 }
 0x29e   :  { %7355 = vmatpush3.msra.mxu1 %v9964_v15  ;;  %7319 = vmatprep.subr.mxu0 %v8293_v53  ;;  %v9968_v15 = vld [vmem:[#allocation43_spill] sm:$0xff] }
 0x29f   :  { %7356 = vmatprep.subr.mxu1 %v9965_v7  ;;  %7320 = vmatpush3.msra.mxu0 %v8293_v53 }
 0x2a0   :  { %7357 = vmatpush3.msra.mxu1 %v9965_v7  ;;  %7321 = vmatprep.subr.mxu0 %v8382_v14  ;;  %v9969_v7 = vld [vmem:[#allocation46_spill] sm:$0xff] }
 0x2a1   :  { %7358 = vmatprep.subr.mxu1 %v9966_v18  ;;  %7322 = vmatpush3.msra.mxu0 %v8382_v14 }
 0x2a2   :  { %7359 = vmatpush3.msra.mxu1 %v9966_v18  ;;  %7323 = vmatprep.subr.mxu0 %v8387_v20  ;;  %v9970_v18 = vld [vmem:[#allocation47_spill] sm:$0xff] }
 0x2a3   :  { %7360 = vmatprep.subr.mxu1 %v9967_v29  ;;  %7324 = vmatpush3.msra.mxu0 %v8387_v20 }
 0x2a4   :  { %7361 = vmatpush3.msra.mxu1 %v9967_v29  ;;  %7325 = vmatprep.subr.mxu0 %v8397_v26  ;;  %v9971_v29 = vld [vmem:[#allocation49_spill] sm:$0xff] }
 0x2a5   :  { %7362 = vmatprep.subr.mxu1 %v9968_v15  ;;  %7326 = vmatpush3.msra.mxu0 %v8397_v26 }
 0x2a6   :  { %7363 = vmatpush3.msra.mxu1 %v9968_v15  ;;  %7327 = vmatprep.subr.mxu0 %v8409_v37  ;;  %v9972_v15 = vld [vmem:[#allocation50_spill] sm:$0xff] }
 0x2a7   :  { %7364 = vmatprep.subr.mxu1 %v9969_v7  ;;  %7328 = vmatpush3.msra.mxu0 %v8409_v37 }
 0x2a8   :  { %7365 = vmatpush3.msra.mxu1 %v9969_v7  ;;  %7329 = vmatprep.subr.mxu0 %v8424_v59 }
 0x2a9   :  { %7366 = vmatprep.subr.mxu1 %v9970_v18  ;;  %7330 = vmatpush3.msra.mxu0 %v8424_v59 }
 0x2aa   :  { %7367 = vmatpush3.msra.mxu1 %v9970_v18  ;;  %7331 = vmatprep.subr.mxu0 %v8435_v12 }
 0x2ab   :  { %7368 = vmatprep.subr.mxu1 %v9971_v29  ;;  %7332 = vmatpush3.msra.mxu0 %v8435_v12 }
 0x2ac   :  { %7369 = vmatpush3.msra.mxu1 %v9971_v29  ;;  %7333 = vmatprep.subr.mxu0 %v8450_v11 }
 0x2ad   :  { %7370 = vmatprep.subr.mxu1 %v9972_v15  ;;  %7334 = vmatpush3.msra.mxu0 %v8450_v11 }
 0x2ae   :  { %7371 = vmatpush3.msra.mxu1 %v9972_v15  ;;  %7335 = vmatprep.subr.mxu0 %v8467_v6 }
 0x2af   :  { %7410 = vmatprep.subr.mxu1 %v8224_v19  ;;  %7336 = vmatpush3.msra.mxu0 %v8467_v6 }
 0x2b0   :  { %7375 = vmatprep.subr.mxu0 %v8238_v31 }
 0x2f6   :  { %v7122_v18 = vpop.f32.mrf.mxu1 }
 0x2f8   :  { %v2038_v29 = vpop.f32.mrf.mxu1 }
 0x2fe   :  { %v7087_v7 = vpop.f32.mrf.mxu0 }
 0x2ff   :  { %v2045_v4 = vadd.f32 %v7122_v18, %v7087_v7 }
 0x300   :  { %v1877_v50 = vpop.f32.mrf.mxu0 }
 0x301   :  { %v2039_v10 = vadd.f32 %v2038_v29, %v1877_v50  ;;  %v9004_v50 = vmul.f32 %v8755_v5, %v8755_v5 }
 0x303   :  { %9973 = vst [vmem:[#allocation52_spill] sm:$0xff] %v9004_v50 }
 0x317   :  { %v7192_v21 = vpop.f32.mrf.mxu1 }
 0x319   :  { %v2244_v8 = vpop.f32.mrf.mxu1 }
 0x31f   :  { %v7157_v45 = vpop.f32.mrf.mxu0 }
 0x320   :  { %v2156_v13 = vadd.f32 %v7157_v45, %v2045_v4  ;;  %v9976_v45 = vld [vmem:[#allocation51_spill] sm:$0xff] }
 0x321   :  { %v2148_v41 = vpop.f32.mrf.mxu0 }
 0x322   :  { %v2149_v58 = vadd.f32 %v2148_v41, %v2039_v10  ;;  %v2253_v15 = vadd.f32 %v7192_v21, %v2156_v13 }
 0x324   :  { %v2245_v28 = vadd.f32 %v2244_v8, %v2149_v58 }
 0x339   :  { %v7262_v1 = vpop.f32.mrf.mxu1 }
 0x33b   :  { %v2464_v27 = vpop.f32.mrf.mxu1 }
 0x33f   :  { %v7276_v23 = vpop.f32.mrf.mxu1 }
 0x340   :  { %v7227_v62 = vpop.f32.mrf.mxu0 }
 0x341   :  { %v2378_v2 = vadd.f32 %v7227_v62, %v2253_v15  ;;  %v2646_v8 = vpop.f32.mrf.mxu1  ;;  %v9013_v62 = vmul.f32 %v9976_v45, %v9976_v45 }
 0x342   :  { %v2371_v9 = vpop.f32.mrf.mxu0 }
 0x343   :  { %v2471_v33 = vadd.f32 %v7262_v1, %v2378_v2  ;;  %v2372_v54 = vadd.f32 %v2371_v9, %v2245_v28 }
 0x344   :  { %v7269_v7 = vpop.f32.mrf.mxu0 }
 0x345   :  { %v9006_v18 = vmul.f32 %v2471_v33, %v2471_v33  ;;  %v9009_v41 = vmul.f32 %v2471_v33, %v8755_v5  ;;  %v2465_v13 = vadd.f32 %v2464_v27, %v2372_v54  ;;  %v2653_v28 = vadd.f32 %v7276_v23, %v7269_v7 }
 0x346   :  { %v2555_v58 = vpop.f32.mrf.mxu0 }
 0x347   :  { %9974 = vst [vmem:[#allocation53_spill] sm:$0xff] %v9006_v18  ;;  %9975 = vst [vmem:[#allocation54_spill] sm:$0xff] %v9009_v41  ;;  %v9017_v9 = vadd.f32 %v9006_v18, %v9004_v50  ;;  %v9019_v2 = vmul.f32 %v2465_v13, %v2465_v13  ;;  %v9022_v1 = vmul.f32 %v2465_v13, %v9976_v45 }
 0x348   :  { %v7283_v21 = vpop.f32.mrf.mxu0  ;;  %v2647_v54 = vadd.f32 %v2646_v8, %v2555_v58 }
 0x349   :  { %9977 = vst [vmem:[#allocation51_spill] sm:$0xff] %v9017_v9  ;;  %9978 = vst [vmem:[#allocation55_spill] sm:$0xff] %v9019_v2  ;;  %v9026_v5 = vadd.f32 %v9019_v2, %v9013_v62  ;;  %v7290_v33 = vpop.f32.mrf.mxu1  ;;  %v2736_v27 = vadd.f32 %v7283_v21, %v2653_v28  ;;  %v9995_v2 = vld [vmem:[#allocation18_spill] sm:$0xff] }
 0x34a   :  { %9979 = vst [vmem:[#allocation56_spill] sm:$0xff] %v9022_v1  ;;  %v2728_v10 = vpop.f32.mrf.mxu0 }
 0x34b   :  { %9980 = vst [vmem:[#allocation57_spill] sm:$0xff] %v9026_v5  ;;  %v2729_v4 = vadd.f32 %v2728_v10, %v2647_v54  ;;  %v2810_v15 = vpop.f32.mrf.mxu1  ;;  %v2819_v29 = vadd.f32 %v7290_v33, %v2736_v27 }
 0x34d   :  { %v2811_v41 = vadd.f32 %v2810_v15, %v2729_v4 }
 0x34e   :  { %v7297_v9 = vpop.f32.mrf.mxu0 }
 0x34f   :  { %v2902_v18 = vadd.f32 %v7297_v9, %v2819_v29  ;;  %v7304_v50 = vpop.f32.mrf.mxu1  ;;  %v9981_v29 = vld [vmem:[#allocation35_spill] sm:$0xff] }
 0x350   :  { %v2895_v30 = vpop.f32.mrf.mxu0 }
 0x351   :  { %v2981_v13 = vadd.f32 %v7304_v50, %v2902_v18  ;;  %v2896_v45 = vadd.f32 %v2895_v30, %v2811_v41  ;;  %v2974_v23 = vpop.f32.mrf.mxu1 }
 0x353   :  { %v9028_v7 = vand.u32 4294901760, %v2981_v13  ;;  %v2975_v1 = vadd.f32 %v2974_v23, %v2896_v45  ;;  %v9982_v45 = vld [vmem:[#allocation36_spill] sm:$0xff] }
 0x355   :  { %v9031_v5 = vsub.f32 %v2981_v13, %v9028_v7  ;;  %v9033_v8 = vand.u32 4294901760, %v2975_v1 }
 0x357   :  { %v3077_v58 = vand.u32 4294901760, %v9031_v5  ;;  %v3066_v28 = vsub.f32 %v2975_v1, %v9033_v8  ;;  %7372 = vmatprep.mubr.f32.mxu1 %v9033_v8  ;;  %v9122_v1 = vld [vmem:[#allocation8 + $0x8] sm:$0xff] }
 0x358   :  { %7373 = vmatmul.mubr.f32.vlgmr.msra.gmra.mxu1 %v9028_v7  ;;  %v3671_v21 = vmul.f32 %v9122_v1, %v9122_v1 }
 0x359   :  { %7411 = vmatpush3.msra.mxu1 %v8224_v19  ;;  %v3067_v30 = vand.u32 4294901760, %v3066_v28  ;;  %v3078_v50 = vsub.f32 %v9031_v5, %v3077_v58 }
 0x35a   :  { %7412 = vmatprep.subr.mxu1 %v8231_v25  ;;  %v9138_v33 = vand.u32 4294901760, %v3671_v21 }
 0x35b   :  { %7413 = vmatpush3.msra.mxu1 %v8231_v25  ;;  %7442 = vmatprep.mubr.f32.mxu1 %v3067_v30  ;;  %v3068_v18 = vsub.f32 %v3066_v28, %v3067_v30  ;;  %v3079_v9 = vand.u32 4294901760, %v3078_v50  ;;  %v9985_v50 = vld [vmem:[#allocation42_spill] sm:$0xff] }
 0x35c   :  { %7414 = vmatprep.subr.mxu1 %v8240_v32  ;;  %v3789_v10 = vsub.f32 %v3671_v21, %v9138_v33  ;;  %v9988_v21 = vld [vmem:[#allocation48_spill] sm:$0xff] }
 0x35d   :  { %7415 = vmatpush3.msra.mxu1 %v8240_v32  ;;  %v3069_v41 = vand.u32 4294901760, %v3068_v18 }
 0x35e   :  { %7416 = vmatprep.subr.mxu1 %v8248_v36  ;;  %v3790_v15 = vand.u32 4294901760, %v3789_v10 }
 0x35f   :  { %7417 = vmatpush3.msra.mxu1 %v8248_v36  ;;  %7337 = vmatprep.mubr.f32.mxu0 %v3069_v41  ;;  %v9986_v41 = vld [vmem:[#allocation44_spill] sm:$0xff] }
 0x360   :  { %7418 = vmatprep.subr.mxu1 %v8257_v40  ;;  %7338 = vmatmul.mubr.f32.vlgmr.msra.gmra.mxu0 %v3079_v9  ;;  %v3791_v23 = vsub.f32 %v3789_v10, %v3790_v15  ;;  %v9987_v9 = vld [vmem:[#allocation45_spill] sm:$0xff] }
 0x361   :  { %7376 = vmatpush3.msra.mxu0 %v8238_v31  ;;  %7419 = vmatpush3.msra.mxu1 %v8257_v40 }
 0x362   :  { %7377 = vmatprep.subr.mxu0 %v8246_v35  ;;  %7407 = vmatprep.mubr.f32.mxu0 %v3066_v28  ;;  %v9984_v28 = vld [vmem:[#allocation40_spill] sm:$0xff]  ;;  %v3792_v30 = vand.u32 4294901760, %v3791_v23 }
 0x363   :  { %7420 = vmatprep.subr.mxu1 %v8267_v44  ;;  %7378 = vmatpush3.msra.mxu0 %v8246_v35  ;;  %v9990_v23 = vld [vmem:[#allocation16_spill] sm:$0xff] }
 0x364   :  { %7421 = vmatpush3.msra.mxu1 %v8267_v44  ;;  %7379 = vmatprep.subr.mxu0 %v8255_v39 }
 0x365   :  { %7422 = vmatprep.subr.mxu1 %v8281_v49  ;;  %7380 = vmatpush3.msra.mxu0 %v8255_v39 }
 0x366   :  { %7423 = vmatpush3.msra.mxu1 %v8281_v49  ;;  %7381 = vmatprep.subr.mxu0 %v8265_v43 }
 0x367   :  { %7424 = vmatprep.subr.mxu1 %v8293_v53  ;;  %7382 = vmatpush3.msra.mxu0 %v8265_v43 }
 0x368   :  { %7425 = vmatpush3.msra.mxu1 %v8293_v53  ;;  %7383 = vmatprep.subr.mxu0 %v8279_v48 }
 0x369   :  { %7426 = vmatprep.subr.mxu1 %v8382_v14  ;;  %7384 = vmatpush3.msra.mxu0 %v8279_v48 }
 0x36a   :  { %7427 = vmatpush3.msra.mxu1 %v8382_v14  ;;  %7385 = vmatprep.subr.mxu0 %v8291_v52 }
 0x36b   :  { %7428 = vmatprep.subr.mxu1 %v8387_v20  ;;  %7386 = vmatpush3.msra.mxu0 %v8291_v52 }
 0x36c   :  { %7429 = vmatpush3.msra.mxu1 %v8387_v20  ;;  %7387 = vmatprep.subr.mxu0 %v8305_v57 }
 0x36d   :  { %7430 = vmatprep.subr.mxu1 %v8397_v26  ;;  %7388 = vmatpush3.msra.mxu0 %v8305_v57 }
 0x36e   :  { %7431 = vmatpush3.msra.mxu1 %v8397_v26  ;;  %7389 = vmatprep.subr.mxu0 %v8319_v61 }
 0x36f   :  { %7432 = vmatprep.subr.mxu1 %v8409_v37  ;;  %7390 = vmatpush3.msra.mxu0 %v8319_v61 }
 0x370   :  { %7433 = vmatpush3.msra.mxu1 %v8409_v37  ;;  %7391 = vmatprep.subr.mxu0 %v8385_v17 }
 0x371   :  { %7434 = vmatprep.subr.mxu1 %v8424_v59  ;;  %7392 = vmatpush3.msra.mxu0 %v8385_v17 }
 0x372   :  { %7435 = vmatpush3.msra.mxu1 %v8424_v59  ;;  %7393 = vmatprep.subr.mxu0 %v8395_v24 }
 0x373   :  { %7436 = vmatprep.subr.mxu1 %v8435_v12  ;;  %7394 = vmatpush3.msra.mxu0 %v8395_v24 }
 0x374   :  { %7437 = vmatpush3.msra.mxu1 %v8435_v12  ;;  %7395 = vmatprep.subr.mxu0 %v8407_v34 }
 0x375   :  { %7438 = vmatprep.subr.mxu1 %v8450_v11  ;;  %7396 = vmatpush3.msra.mxu0 %v8407_v34 }
 0x376   :  { %7439 = vmatpush3.msra.mxu1 %v8450_v11  ;;  %7397 = vmatprep.subr.mxu0 %v8421_v55 }
 0x377   :  { %7440 = vmatprep.subr.mxu1 %v8467_v6  ;;  %7398 = vmatpush3.msra.mxu0 %v8421_v55 }
 0x378   :  { %7441 = vmatpush3.msra.mxu1 %v8467_v6  ;;  %7399 = vmatprep.subr.mxu0 %v8439_v16 }
 0x379   :  { %7443 = vmatmul.mubr.f32.vlgmr.msra.gmra.mxu1 %v3077_v58  ;;  %7480 = vmatprep.subr.mxu1 %v8224_v19 }
 0x37a   :  { %7400 = vmatpush3.msra.mxu0 %v8439_v16  ;;  %7481 = vmatpush3.msra.mxu1 %v8224_v19 }
 0x37b   :  { %7512 = vmatprep.mubr.f32.mxu1 %v9033_v8  ;;  %7401 = vmatprep.subr.mxu0 %v8448_v46 }
 0x37c   :  { %7482 = vmatprep.subr.mxu1 %v8231_v25  ;;  %7402 = vmatpush3.msra.mxu0 %v8448_v46 }
 0x37d   :  { %7483 = vmatpush3.msra.mxu1 %v8231_v25  ;;  %7403 = vmatprep.subr.mxu0 %v8465_v63 }
 0x37e   :  { %7484 = vmatprep.subr.mxu1 %v8240_v32  ;;  %7404 = vmatpush3.msra.mxu0 %v8465_v63 }
 0x37f   :  { %7485 = vmatpush3.msra.mxu1 %v8240_v32  ;;  %7405 = vmatprep.subr.mxu0 %v8481_v22 }
 0x380   :  { %7486 = vmatprep.subr.mxu1 %v8248_v36  ;;  %7406 = vmatpush3.msra.mxu0 %v8481_v22 }
 0x381   :  { %7487 = vmatpush3.msra.mxu1 %v8248_v36  ;;  %7408 = vmatmul.mubr.f32.vlgmr.msra.gmra.mxu0 %v9031_v5  ;;  %v9130_v5 = vld [vmem:[#allocation8] sm:$0xff] }
 0x382   :  { %7445 = vmatprep.subr.mxu0 %v8252_v38  ;;  %7488 = vmatprep.subr.mxu1 %v8257_v40  ;;  %v3670_v54 = vmul.f32 %v9130_v5, %v9130_v5 }
 0x383   :  { %7446 = vmatpush3.msra.mxu0 %v8252_v38  ;;  %7477 = vmatprep.mubr.f32.mxu0 %v9033_v8  ;;  %v9983_v8 = vld [vmem:[#allocation38_spill] sm:$0xff] }
 0x384   :  { %7489 = vmatpush3.msra.mxu1 %v8257_v40  ;;  %7447 = vmatprep.subr.mxu0 %v8262_v42  ;;  %v9144_v27 = vand.u32 4294901760, %v3670_v54 }
 0x385   :  { %7490 = vmatprep.subr.mxu1 %v8267_v44  ;;  %7448 = vmatpush3.msra.mxu0 %v8262_v42 }
 0x386   :  { %7491 = vmatpush3.msra.mxu1 %v8267_v44  ;;  %7449 = vmatprep.subr.mxu0 %v8276_v47  ;;  %v3796_v4 = vsub.f32 %v3670_v54, %v9144_v27  ;;  %v9989_v54 = vld [vmem:[#allocation15_spill] sm:$0xff] }
 0x387   :  { %7492 = vmatprep.subr.mxu1 %v8281_v49  ;;  %7450 = vmatpush3.msra.mxu0 %v8276_v47 }
 0x388   :  { %7493 = vmatpush3.msra.mxu1 %v8281_v49  ;;  %7451 = vmatprep.subr.mxu0 %v8288_v51  ;;  %v3797_v13 = vand.u32 4294901760, %v3796_v4 }
 0x389   :  { %7494 = vmatprep.subr.mxu1 %v8293_v53  ;;  %7452 = vmatpush3.msra.mxu0 %v8288_v51 }
 0x38a   :  { %7495 = vmatpush3.msra.mxu1 %v8293_v53  ;;  %7453 = vmatprep.subr.mxu0 %v8302_v56  ;;  %v3798_v58 = vsub.f32 %v3796_v4, %v3797_v13 }
 0x38b   :  { %7496 = vmatprep.subr.mxu1 %v8382_v14  ;;  %7454 = vmatpush3.msra.mxu0 %v8302_v56 }
 0x38c   :  { %7497 = vmatpush3.msra.mxu1 %v8382_v14  ;;  %7455 = vmatprep.subr.mxu0 %v8316_v60  ;;  %v3799_v18 = vand.u32 4294901760, %v3798_v58  ;;  %v9991_v58 = vld [vmem:[#allocation21_spill] sm:$0xff] }
 0x38d   :  { %7498 = vmatprep.subr.mxu1 %v8387_v20  ;;  %7456 = vmatpush3.msra.mxu0 %v8316_v60 }
 0x38e   :  { %7499 = vmatpush3.msra.mxu1 %v8387_v20  ;;  %7457 = vmatprep.subr.mxu0 %v8330_v0 }
 0x38f   :  { %7500 = vmatprep.subr.mxu1 %v8397_v26  ;;  %7458 = vmatpush3.msra.mxu0 %v8330_v0 }
 0x390   :  { %7501 = vmatpush3.msra.mxu1 %v8397_v26  ;;  %7459 = vmatprep.subr.mxu0 %v8341_v3 }
 0x391   :  { %7502 = vmatprep.subr.mxu1 %v8409_v37  ;;  %7460 = vmatpush3.msra.mxu0 %v8341_v3 }
 0x392   :  { %7503 = vmatpush3.msra.mxu1 %v8409_v37  ;;  %7461 = vmatprep.subr.mxu0 %v9981_v29 }
 0x393   :  { %7504 = vmatprep.subr.mxu1 %v8424_v59  ;;  %7462 = vmatpush3.msra.mxu0 %v9981_v29 }
 0x394   :  { %7505 = vmatpush3.msra.mxu1 %v8424_v59  ;;  %7463 = vmatprep.subr.mxu0 %v9982_v45 }
 0x395   :  { %7506 = vmatprep.subr.mxu1 %v8435_v12  ;;  %7464 = vmatpush3.msra.mxu0 %v9982_v45 }
 0x396   :  { %7507 = vmatpush3.msra.mxu1 %v8435_v12  ;;  %7465 = vmatprep.subr.mxu0 %v9983_v8 }
 0x397   :  { %7508 = vmatprep.subr.mxu1 %v8450_v11  ;;  %7466 = vmatpush3.msra.mxu0 %v9983_v8 }
 0x398   :  { %7509 = vmatpush3.msra.mxu1 %v8450_v11  ;;  %7467 = vmatprep.subr.mxu0 %v9984_v28 }
 0x399   :  { %7510 = vmatprep.subr.mxu1 %v8467_v6  ;;  %7468 = vmatpush3.msra.mxu0 %v9984_v28 }
 0x39a   :  { %7511 = vmatpush3.msra.mxu1 %v8467_v6  ;;  %7469 = vmatprep.subr.mxu0 %v9985_v50 }
 0x39b   :  { %7513 = vmatmul.mubr.f32.vlgmr.msra.gmra.mxu1 %v9028_v7  ;;  %7470 = vmatpush3.msra.mxu0 %v9985_v50 }
 0x39c   :  { %7471 = vmatprep.subr.mxu0 %v9986_v41  ;;  %7522 = vmatprep.subr.mxu1 %v3792_v30 }
 0x39d   :  { %7472 = vmatpush3.msra.mxu0 %v9986_v41  ;;  %7523 = vmatpush3.msra.mxu1 %v3792_v30  ;;  %v9992_v30 = vld [vmem:[#allocation22_spill] sm:$0xff] }
 0x39e   :  { %7473 = vmatprep.subr.mxu0 %v9987_v9  ;;  %7524 = vmatprep.subr.mxu1 %v3799_v18 }
 0x39f   :  { %7474 = vmatpush3.msra.mxu0 %v9987_v9  ;;  %7525 = vmatpush3.msra.mxu1 %v3799_v18  ;;  %v9994_v18 = vld [vmem:[#allocation19_spill] sm:$0xff] }
 0x3a0   :  { %7475 = vmatprep.subr.mxu0 %v9988_v21  ;;  %7526 = vmatprep.mubr.f32.mxu1 %v9989_v54 }
 0x3a1   :  { %7476 = vmatpush3.msra.mxu0 %v9988_v21  ;;  %7527 = vmatmul.mubr.f32.vlgmr.msra.gmra.mxu1 %v9990_v23 }
 0x3a2   :  { %7478 = vmatmul.mubr.f32.vlgmr.msra.gmra.mxu0 %v9028_v7  ;;  %7515 = vmatprep.subr.mxu0 %v9138_v33  ;;  %v9993_v7 = vld [vmem:[#allocation17_spill] sm:$0xff] }
 0x3a3   :  { %7516 = vmatpush3.msra.mxu0 %v9138_v33  ;;  %7519 = vmatprep.mubr.f32.mxu0 %v9991_v58  ;;  %v9996_v58 = vld [vmem:[#allocation20_spill] sm:$0xff] }
 0x3a4   :  { %7517 = vmatprep.subr.mxu0 %v9144_v27  ;;  %7536 = vmatprep.subr.mxu1 %v9138_v33 }
 0x3a5   :  { %7518 = vmatpush3.msra.mxu0 %v9144_v27  ;;  %7537 = vmatpush3.msra.mxu1 %v9138_v33 }
 0x3a6   :  { %7520 = vmatmul.mubr.f32.vlgmr.msra.gmra.mxu0 %v9992_v30  ;;  %7529 = vmatprep.subr.mxu0 %v3789_v10 }
 0x3a7   :  { %7530 = vmatpush3.msra.mxu0 %v3789_v10  ;;  %7538 = vmatprep.subr.mxu1 %v9144_v27  ;;  %v9997_v10 = vld [vmem:[#allocation23_spill] sm:$0xff] }
 0x3a8   :  { %7531 = vmatprep.subr.mxu0 %v3796_v4  ;;  %7533 = vmatprep.mubr.f32.mxu0 %v9993_v7 }
 0x3a9   :  { %7532 = vmatpush3.msra.mxu0 %v3796_v4  ;;  %7539 = vmatpush3.msra.mxu1 %v9144_v27  ;;  %v10000_v4 = vld [vmem:[#allocation29_spill] sm:$0xff] }
 0x3aa   :  { %7540 = vmatprep.mubr.f32.mxu1 %v9994_v18  ;;  %7534 = vmatmul.mubr.f32.vlgmr.msra.gmra.mxu0 %v9995_v2 }
 0x3ab   :  { %7541 = vmatmul.mubr.f32.vlgmr.msra.gmra.mxu1 %v9996_v58  ;;  %7543 = vmatprep.subr.mxu0 %v3790_v15 }
 0x3ac   :  { %7550 = vmatprep.subr.mxu1 %v9138_v33  ;;  %7544 = vmatpush3.msra.mxu0 %v3790_v15  ;;  %v10001_v15 = vld [vmem:[#allocation31_spill] sm:$0xff] }
 0x3ad   :  { %7551 = vmatpush3.msra.mxu1 %v9138_v33  ;;  %7545 = vmatprep.subr.mxu0 %v3797_v13  ;;  %v9998_v33 = vld [vmem:[#allocation25_spill] sm:$0xff] }
 0x3ae   :  { %7552 = vmatprep.subr.mxu1 %v9144_v27  ;;  %7546 = vmatpush3.msra.mxu0 %v3797_v13  ;;  %v10002_v13 = vld [vmem:[#allocation32_spill] sm:$0xff] }
 0x3af   :  { %7547 = vmatprep.mubr.f32.mxu0 %v9989_v54  ;;  %7553 = vmatpush3.msra.mxu1 %v9144_v27  ;;  %v9999_v27 = vld [vmem:[#allocation27_spill] sm:$0xff] }
 0x3b0   :  { %7554 = vmatprep.mubr.f32.mxu1 %v9989_v54  ;;  %7548 = vmatmul.mubr.f32.vlgmr.msra.gmra.mxu0 %v9990_v23 }
 0x3b1   :  { %7555 = vmatmul.mubr.f32.vlgmr.msra.gmra.mxu1 %v9990_v23  ;;  %7592 = vmatprep.subr.mxu1 %v9997_v10 }
 0x3b2   :  { %7593 = vmatpush3.msra.mxu1 %v9997_v10  ;;  %7557 = vmatprep.subr.mxu0 %v8224_v19 }
 0x3b3   :  { %7594 = vmatprep.subr.mxu1 %v9998_v33  ;;  %7558 = vmatpush3.msra.mxu0 %v8224_v19 }
 0x3b4   :  { %7595 = vmatpush3.msra.mxu1 %v9998_v33  ;;  %7559 = vmatprep.subr.mxu0 %v8231_v25 }
 0x3b5   :  { %7596 = vmatprep.subr.mxu1 %v9999_v27  ;;  %7560 = vmatpush3.msra.mxu0 %v8231_v25 }
 0x3b6   :  { %7597 = vmatpush3.msra.mxu1 %v9999_v27  ;;  %7561 = vmatprep.subr.mxu0 %v8240_v32  ;;  %v10003_v27 = vld [vmem:[#allocation33_spill] sm:$0xff] }
 0x3b7   :  { %7598 = vmatprep.subr.mxu1 %v10000_v4  ;;  %7562 = vmatpush3.msra.mxu0 %v8240_v32 }
 0x3b8   :  { %7599 = vmatpush3.msra.mxu1 %v10000_v4  ;;  %7563 = vmatprep.subr.mxu0 %v8248_v36  ;;  %v10004_v4 = vld [vmem:[#allocation34_spill] sm:$0xff] }
 0x3b9   :  { %7600 = vmatprep.subr.mxu1 %v10001_v15  ;;  %7564 = vmatpush3.msra.mxu0 %v8248_v36 }
 0x3ba   :  { %7601 = vmatpush3.msra.mxu1 %v10001_v15  ;;  %7565 = vmatprep.subr.mxu0 %v8257_v40  ;;  %v10005_v15 = vld [vmem:[#allocation37_spill] sm:$0xff] }
 0x3bb   :  { %7602 = vmatprep.subr.mxu1 %v10002_v13  ;;  %7566 = vmatpush3.msra.mxu0 %v8257_v40 }
 0x3bc   :  { %7603 = vmatpush3.msra.mxu1 %v10002_v13  ;;  %7567 = vmatprep.subr.mxu0 %v8267_v44  ;;  %v10006_v13 = vld [vmem:[#allocation39_spill] sm:$0xff] }
 0x3bd   :  { %7604 = vmatprep.subr.mxu1 %v10003_v27  ;;  %7568 = vmatpush3.msra.mxu0 %v8267_v44 }
 0x3be   :  { %7605 = vmatpush3.msra.mxu1 %v10003_v27  ;;  %7569 = vmatprep.subr.mxu0 %v8281_v49  ;;  %v10007_v27 = vld [vmem:[#allocation41_spill] sm:$0xff] }
 0x3bf   :  { %7606 = vmatprep.subr.mxu1 %v10004_v4  ;;  %7570 = vmatpush3.msra.mxu0 %v8281_v49 }
 0x3c0   :  { %7607 = vmatpush3.msra.mxu1 %v10004_v4  ;;  %7571 = vmatprep.subr.mxu0 %v8293_v53  ;;  %v10008_v4 = vld [vmem:[#allocation43_spill] sm:$0xff] }
 0x3c1   :  { %7608 = vmatprep.subr.mxu1 %v10005_v15  ;;  %7572 = vmatpush3.msra.mxu0 %v8293_v53 }
 0x3c2   :  { %7609 = vmatpush3.msra.mxu1 %v10005_v15  ;;  %7573 = vmatprep.subr.mxu0 %v8382_v14  ;;  %v10009_v15 = vld [vmem:[#allocation46_spill] sm:$0xff] }
 0x3c3   :  { %7610 = vmatprep.subr.mxu1 %v10006_v13  ;;  %7574 = vmatpush3.msra.mxu0 %v8382_v14 }
 0x3c4   :  { %7611 = vmatpush3.msra.mxu1 %v10006_v13  ;;  %7575 = vmatprep.subr.mxu0 %v8387_v20  ;;  %v10010_v13 = vld [vmem:[#allocation47_spill] sm:$0xff] }
 0x3c5   :  { %7612 = vmatprep.subr.mxu1 %v10007_v27  ;;  %7576 = vmatpush3.msra.mxu0 %v8387_v20 }
 0x3c6   :  { %7613 = vmatpush3.msra.mxu1 %v10007_v27  ;;  %7577 = vmatprep.subr.mxu0 %v8397_v26  ;;  %v10011_v27 = vld [vmem:[#allocation49_spill] sm:$0xff] }
 0x3c7   :  { %7614 = vmatprep.subr.mxu1 %v10008_v4  ;;  %7578 = vmatpush3.msra.mxu0 %v8397_v26 }
 0x3c8   :  { %7615 = vmatpush3.msra.mxu1 %v10008_v4  ;;  %7579 = vmatprep.subr.mxu0 %v8409_v37  ;;  %v10012_v4 = vld [vmem:[#allocation50_spill] sm:$0xff] }
 0x3c9   :  { %7616 = vmatprep.subr.mxu1 %v10009_v15  ;;  %7580 = vmatpush3.msra.mxu0 %v8409_v37 }
 0x3ca   :  { %7617 = vmatpush3.msra.mxu1 %v10009_v15  ;;  %7581 = vmatprep.subr.mxu0 %v8424_v59 }
 0x3cb   :  { %7618 = vmatprep.subr.mxu1 %v10010_v13  ;;  %7582 = vmatpush3.msra.mxu0 %v8424_v59 }
 0x3cc   :  { %7619 = vmatpush3.msra.mxu1 %v10010_v13  ;;  %7583 = vmatprep.subr.mxu0 %v8435_v12 }
 0x3cd   :  { %7620 = vmatprep.subr.mxu1 %v10011_v27  ;;  %7584 = vmatpush3.msra.mxu0 %v8435_v12 }
 0x3ce   :  { %7621 = vmatpush3.msra.mxu1 %v10011_v27  ;;  %7585 = vmatprep.subr.mxu0 %v8450_v11 }
 0x3cf   :  { %7622 = vmatprep.subr.mxu1 %v10012_v4  ;;  %7586 = vmatpush3.msra.mxu0 %v8450_v11 }
 0x3d0   :  { %7623 = vmatpush3.msra.mxu1 %v10012_v4  ;;  %7587 = vmatprep.subr.mxu0 %v8467_v6 }
 0x3d1   :  { %7662 = vmatprep.subr.mxu1 %v8224_v19  ;;  %7588 = vmatpush3.msra.mxu0 %v8467_v6 }
 0x3d2   :  { %7627 = vmatprep.subr.mxu0 %v8238_v31 }
 0x418   :  { %v7374_v13 = vpop.f32.mrf.mxu1 }
 0x41a   :  { %v3232_v27 = vpop.f32.mrf.mxu1 }
 0x420   :  { %v7339_v15 = vpop.f32.mrf.mxu0 }
 0x421   :  { %v3239_v33 = vadd.f32 %v7374_v13, %v7339_v15 }
 0x422   :  { %v3071_v10 = vpop.f32.mrf.mxu0 }
 0x423   :  { %v3233_v58 = vadd.f32 %v3232_v27, %v3071_v10 }
 0x439   :  { %v7444_v18 = vpop.f32.mrf.mxu1 }
 0x43b   :  { %v3438_v54 = vpop.f32.mrf.mxu1 }
 0x441   :  { %v7409_v2 = vpop.f32.mrf.mxu0 }
 0x442   :  { %v3350_v7 = vadd.f32 %v7409_v2, %v3239_v33 }
 0x443   :  { %v3342_v30 = vpop.f32.mrf.mxu0 }
 0x444   :  { %v3343_v23 = vadd.f32 %v3342_v30, %v3233_v58  ;;  %v3447_v4 = vadd.f32 %v7444_v18, %v3350_v7 }
 0x446   :  { %v3439_v21 = vadd.f32 %v3438_v54, %v3343_v23 }
 0x45b   :  { %v7514_v9 = vpop.f32.mrf.mxu1 }
 0x45d   :  { %v3658_v41 = vpop.f32.mrf.mxu1 }
 0x461   :  { %v7528_v8 = vpop.f32.mrf.mxu1 }
 0x462   :  { %v7479_v50 = vpop.f32.mrf.mxu0 }
 0x463   :  { %v3572_v28 = vadd.f32 %v7479_v50, %v3447_v4  ;;  %v3836_v2 = vpop.f32.mrf.mxu1 }
 0x464   :  { %v3565_v45 = vpop.f32.mrf.mxu0 }
 0x465   :  { %v9279_v29 = vadd.f32 %v7514_v9, %v3572_v28  ;;  %v3566_v15 = vadd.f32 %v3565_v45, %v3439_v21 }
 0x466   :  { %v7521_v13 = vpop.f32.mrf.mxu0 }
 0x467   :  { %10013 = vst [vmem:[#allocation58_spill] sm:$0xff] %v9279_v29  ;;  %v9283_v27 = vadd.f32 %v3658_v41, %v3566_v15  ;;  %v3843_v23 = vadd.f32 %v7528_v8, %v7521_v13 }
 0x468   :  { %v3745_v58 = vpop.f32.mrf.mxu0 }
 0x469   :  { %v3837_v7 = vadd.f32 %v3836_v2, %v3745_v58 }
 0x46a   :  { %v7535_v30 = vpop.f32.mrf.mxu0 }
 0x46b   :  { %v3926_v50 = vadd.f32 %v7535_v30, %v3843_v23  ;;  %v7542_v18 = vpop.f32.mrf.mxu1  ;;  %v8034_v23 = vld [vmem:[#allocation7 + $0x8] sm:$0xff] }
 0x46c   :  { %v3918_v33 = vpop.f32.mrf.mxu0  ;;  %v4861_v30 = vmul.f32 %v8034_v23, %v9122_v1  ;;  %v10025_v23 = vld [vmem:[#allocation48_spill] sm:$0xff] }
 0x46d   :  { %v4009_v28 = vadd.f32 %v7542_v18, %v3926_v50  ;;  %v3919_v9 = vadd.f32 %v3918_v33, %v3837_v7  ;;  %v4000_v45 = vpop.f32.mrf.mxu1  ;;  %v8035_v7 = vld [vmem:[#allocation7] sm:$0xff] }
 0x46e   :  { %v4860_v50 = vmul.f32 %v8035_v7, %v9130_v5  ;;  %v9391_v1 = vand.u32 4294901760, %v4861_v30  ;;  %v10015_v5 = vld [vmem:[#allocation26_spill] sm:$0xff]  ;;  %v10027_v7 = vld [vmem:[#allocation16_spill] sm:$0xff] }
 0x46f   :  { %v4001_v21 = vadd.f32 %v4000_v45, %v3919_v9  ;;  %v10017_v45 = vld [vmem:[#allocation30_spill] sm:$0xff] }
 0x470   :  { %v7549_v4 = vpop.f32.mrf.mxu0  ;;  %v9397_v18 = vand.u32 4294901760, %v4860_v50  ;;  %v4979_v33 = vsub.f32 %v4861_v30, %v9391_v1  ;;  %v10026_v30 = vld [vmem:[#allocation15_spill] sm:$0xff] }
 0x471   :  { %v4092_v0 = vadd.f32 %v7549_v4, %v4009_v28  ;;  %v7556_v10 = vpop.f32.mrf.mxu1  ;;  %v10016_v28 = vld [vmem:[#allocation28_spill] sm:$0xff]  ;;  %v10018_v4 = vld [vmem:[#allocation35_spill] sm:$0xff] }
 0x472   :  { %v4085_v41 = vpop.f32.mrf.mxu0  ;;  %v4986_v9 = vsub.f32 %v4860_v50, %v9397_v18  ;;  %v10028_v50 = vld [vmem:[#allocation21_spill] sm:$0xff] }
 0x473   :  { %v4171_v15 = vadd.f32 %v7556_v10, %v4092_v0  ;;  %v4086_v3 = vadd.f32 %v4085_v41, %v4001_v21  ;;  %v4164_v29 = vpop.f32.mrf.mxu1  ;;  %v4980_v21 = vand.u32 4294901760, %v4979_v33 }
 0x474   :  { %v4987_v41 = vand.u32 4294901760, %v4986_v9 }
 0x475   :  { %v9287_v60 = vand.u32 4294901760, %v4171_v15  ;;  %v4165_v54 = vadd.f32 %v4164_v29, %v4086_v3 }
 0x477   :  { %v9290_v8 = vsub.f32 %v4171_v15, %v9287_v60  ;;  %v9292_v13 = vand.u32 4294901760, %v4165_v54  ;;  %v10019_v15 = vld [vmem:[#allocation36_spill] sm:$0xff] }
 0x479   :  { %v4267_v2 = vand.u32 4294901760, %v9290_v8  ;;  %v4256_v58 = vsub.f32 %v4165_v54, %v9292_v13  ;;  %7624 = vmatprep.mubr.f32.mxu1 %v9292_v13 }
 0x47a   :  { %7625 = vmatmul.mubr.f32.vlgmr.msra.gmra.mxu1 %v9287_v60 }
 0x47b   :  { %7663 = vmatpush3.msra.mxu1 %v8224_v19  ;;  %v4257_v0 = vand.u32 4294901760, %v4256_v58  ;;  %v4268_v3 = vsub.f32 %v9290_v8, %v4267_v2 }
 0x47c   :  { %7664 = vmatprep.subr.mxu1 %v8231_v25 }
 0x47d   :  { %7665 = vmatpush3.msra.mxu1 %v8231_v25  ;;  %7694 = vmatprep.mubr.f32.mxu1 %v4257_v0  ;;  %v4258_v29 = vsub.f32 %v4256_v58, %v4257_v0  ;;  %v4269_v54 = vand.u32 4294901760, %v4268_v3  ;;  %v10022_v3 = vld [vmem:[#allocation42_spill] sm:$0xff] }
 0x47e   :  { %7666 = vmatprep.subr.mxu1 %v8240_v32 }
 0x47f   :  { %7667 = vmatpush3.msra.mxu1 %v8240_v32  ;;  %v4259_v10 = vand.u32 4294901760, %v4258_v29 }
 0x480   :  { %7668 = vmatprep.subr.mxu1 %v8248_v36 }
 0x481   :  { %7669 = vmatpush3.msra.mxu1 %v8248_v36  ;;  %7589 = vmatprep.mubr.f32.mxu0 %v4259_v10  ;;  %v10023_v10 = vld [vmem:[#allocation44_spill] sm:$0xff] }
 0x482   :  { %7670 = vmatprep.subr.mxu1 %v8257_v40  ;;  %7590 = vmatmul.mubr.f32.vlgmr.msra.gmra.mxu0 %v4269_v54  ;;  %v10024_v54 = vld [vmem:[#allocation45_spill] sm:$0xff] }
 0x483   :  { %7628 = vmatpush3.msra.mxu0 %v8238_v31  ;;  %7671 = vmatpush3.msra.mxu1 %v8257_v40 }
 0x484   :  { %7629 = vmatprep.subr.mxu0 %v8246_v35  ;;  %7659 = vmatprep.mubr.f32.mxu0 %v4256_v58  ;;  %v10021_v58 = vld [vmem:[#allocation40_spill] sm:$0xff] }
 0x485   :  { %7672 = vmatprep.subr.mxu1 %v8267_v44  ;;  %7630 = vmatpush3.msra.mxu0 %v8246_v35 }
 0x486   :  { %7673 = vmatpush3.msra.mxu1 %v8267_v44  ;;  %7631 = vmatprep.subr.mxu0 %v8255_v39 }
 0x487   :  { %7674 = vmatprep.subr.mxu1 %v8281_v49  ;;  %7632 = vmatpush3.msra.mxu0 %v8255_v39 }
 0x488   :  { %7675 = vmatpush3.msra.mxu1 %v8281_v49  ;;  %7633 = vmatprep.subr.mxu0 %v8265_v43 }
 0x489   :  { %7676 = vmatprep.subr.mxu1 %v8293_v53  ;;  %7634 = vmatpush3.msra.mxu0 %v8265_v43 }
 0x48a   :  { %7677 = vmatpush3.msra.mxu1 %v8293_v53  ;;  %7635 = vmatprep.subr.mxu0 %v8279_v48 }
 0x48b   :  { %7678 = vmatprep.subr.mxu1 %v8382_v14  ;;  %7636 = vmatpush3.msra.mxu0 %v8279_v48 }
 0x48c   :  { %7679 = vmatpush3.msra.mxu1 %v8382_v14  ;;  %7637 = vmatprep.subr.mxu0 %v8291_v52 }
 0x48d   :  { %7680 = vmatprep.subr.mxu1 %v8387_v20  ;;  %7638 = vmatpush3.msra.mxu0 %v8291_v52 }
 0x48e   :  { %7681 = vmatpush3.msra.mxu1 %v8387_v20  ;;  %7639 = vmatprep.subr.mxu0 %v8305_v57 }
 0x48f   :  { %7682 = vmatprep.subr.mxu1 %v8397_v26  ;;  %7640 = vmatpush3.msra.mxu0 %v8305_v57 }
 0x490   :  { %7683 = vmatpush3.msra.mxu1 %v8397_v26  ;;  %7641 = vmatprep.subr.mxu0 %v8319_v61 }
 0x491   :  { %7684 = vmatprep.subr.mxu1 %v8409_v37  ;;  %7642 = vmatpush3.msra.mxu0 %v8319_v61 }
 0x492   :  { %7685 = vmatpush3.msra.mxu1 %v8409_v37  ;;  %7643 = vmatprep.subr.mxu0 %v8385_v17 }
 0x493   :  { %7686 = vmatprep.subr.mxu1 %v8424_v59  ;;  %7644 = vmatpush3.msra.mxu0 %v8385_v17 }
 0x494   :  { %7687 = vmatpush3.msra.mxu1 %v8424_v59  ;;  %7645 = vmatprep.subr.mxu0 %v8395_v24 }
 0x495   :  { %7688 = vmatprep.subr.mxu1 %v8435_v12  ;;  %7646 = vmatpush3.msra.mxu0 %v8395_v24 }
 0x496   :  { %7689 = vmatpush3.msra.mxu1 %v8435_v12  ;;  %7647 = vmatprep.subr.mxu0 %v8407_v34 }
 0x497   :  { %7690 = vmatprep.subr.mxu1 %v8450_v11  ;;  %7648 = vmatpush3.msra.mxu0 %v8407_v34 }
 0x498   :  { %7691 = vmatpush3.msra.mxu1 %v8450_v11  ;;  %7649 = vmatprep.subr.mxu0 %v8421_v55 }
 0x499   :  { %7692 = vmatprep.subr.mxu1 %v8467_v6  ;;  %7650 = vmatpush3.msra.mxu0 %v8421_v55 }
 0x49a   :  { %7693 = vmatpush3.msra.mxu1 %v8467_v6  ;;  %7651 = vmatprep.subr.mxu0 %v8439_v16 }
 0x49b   :  { %7695 = vmatmul.mubr.f32.vlgmr.msra.gmra.mxu1 %v4267_v2  ;;  %7732 = vmatprep.subr.mxu1 %v8224_v19  ;;  %v4988_v2 = vsub.f32 %v4986_v9, %v4987_v41 }
 0x49c   :  { %7652 = vmatpush3.msra.mxu0 %v8439_v16  ;;  %7733 = vmatpush3.msra.mxu1 %v8224_v19 }
 0x49d   :  { %7764 = vmatprep.mubr.f32.mxu1 %v9292_v13  ;;  %7653 = vmatprep.subr.mxu0 %v8448_v46  ;;  %v4989_v29 = vand.u32 4294901760, %v4988_v2  ;;  %v10030_v2 = vld [vmem:[#allocation17_spill] sm:$0xff] }
 0x49e   :  { %7734 = vmatprep.subr.mxu1 %v8231_v25  ;;  %7654 = vmatpush3.msra.mxu0 %v8448_v46 }
 0x49f   :  { %7735 = vmatpush3.msra.mxu1 %v8231_v25  ;;  %7655 = vmatprep.subr.mxu0 %v8465_v63 }
 0x4a0   :  { %7736 = vmatprep.subr.mxu1 %v8240_v32  ;;  %7656 = vmatpush3.msra.mxu0 %v8465_v63 }
 0x4a1   :  { %7737 = vmatpush3.msra.mxu1 %v8240_v32  ;;  %7657 = vmatprep.subr.mxu0 %v8481_v22 }
 0x4a2   :  { %7738 = vmatprep.subr.mxu1 %v8248_v36  ;;  %7658 = vmatpush3.msra.mxu0 %v8481_v22 }
 0x4a3   :  { %7739 = vmatpush3.msra.mxu1 %v8248_v36  ;;  %7660 = vmatmul.mubr.f32.vlgmr.msra.gmra.mxu0 %v9290_v8  ;;  %v4981_v8 = vsub.f32 %v4979_v33, %v4980_v21 }
 0x4a4   :  { %7697 = vmatprep.subr.mxu0 %v8252_v38  ;;  %7740 = vmatprep.subr.mxu1 %v8257_v40 }
 0x4a5   :  { %7698 = vmatpush3.msra.mxu0 %v8252_v38  ;;  %7729 = vmatprep.mubr.f32.mxu0 %v9292_v13  ;;  %v10020_v13 = vld [vmem:[#allocation38_spill] sm:$0xff]  ;;  %v4982_v0 = vand.u32 4294901760, %v4981_v8 }
 0x4a6   :  { %7741 = vmatpush3.msra.mxu1 %v8257_v40  ;;  %7699 = vmatprep.subr.mxu0 %v8262_v42  ;;  %v10029_v8 = vld [vmem:[#allocation22_spill] sm:$0xff] }
 0x4a7   :  { %7742 = vmatprep.subr.mxu1 %v8267_v44  ;;  %7700 = vmatpush3.msra.mxu0 %v8262_v42 }
 0x4a8   :  { %7743 = vmatpush3.msra.mxu1 %v8267_v44  ;;  %7701 = vmatprep.subr.mxu0 %v8276_v47 }
 0x4a9   :  { %7744 = vmatprep.subr.mxu1 %v8281_v49  ;;  %7702 = vmatpush3.msra.mxu0 %v8276_v47 }
 0x4aa   :  { %7745 = vmatpush3.msra.mxu1 %v8281_v49  ;;  %7703 = vmatprep.subr.mxu0 %v8288_v51 }
 0x4ab   :  { %7746 = vmatprep.subr.mxu1 %v8293_v53  ;;  %7704 = vmatpush3.msra.mxu0 %v8288_v51 }
 0x4ac   :  { %7747 = vmatpush3.msra.mxu1 %v8293_v53  ;;  %7705 = vmatprep.subr.mxu0 %v8302_v56 }
 0x4ad   :  { %7748 = vmatprep.subr.mxu1 %v8382_v14  ;;  %7706 = vmatpush3.msra.mxu0 %v8302_v56 }
 0x4ae   :  { %7749 = vmatpush3.msra.mxu1 %v8382_v14  ;;  %7707 = vmatprep.subr.mxu0 %v10015_v5 }
 0x4af   :  { %7750 = vmatprep.subr.mxu1 %v8387_v20  ;;  %7708 = vmatpush3.msra.mxu0 %v10015_v5 }
 0x4b0   :  { %7751 = vmatpush3.msra.mxu1 %v8387_v20  ;;  %7709 = vmatprep.subr.mxu0 %v10016_v28 }
 0x4b1   :  { %7752 = vmatprep.subr.mxu1 %v8397_v26  ;;  %7710 = vmatpush3.msra.mxu0 %v10016_v28 }
 0x4b2   :  { %7753 = vmatpush3.msra.mxu1 %v8397_v26  ;;  %7711 = vmatprep.subr.mxu0 %v10017_v45 }
 0x4b3   :  { %7754 = vmatprep.subr.mxu1 %v8409_v37  ;;  %7712 = vmatpush3.msra.mxu0 %v10017_v45 }
 0x4b4   :  { %7755 = vmatpush3.msra.mxu1 %v8409_v37  ;;  %7713 = vmatprep.subr.mxu0 %v10018_v4 }
 0x4b5   :  { %7756 = vmatprep.subr.mxu1 %v8424_v59  ;;  %7714 = vmatpush3.msra.mxu0 %v10018_v4 }
 0x4b6   :  { %7757 = vmatpush3.msra.mxu1 %v8424_v59  ;;  %7715 = vmatprep.subr.mxu0 %v10019_v15 }
 0x4b7   :  { %7758 = vmatprep.subr.mxu1 %v8435_v12  ;;  %7716 = vmatpush3.msra.mxu0 %v10019_v15 }
 0x4b8   :  { %7759 = vmatpush3.msra.mxu1 %v8435_v12  ;;  %7717 = vmatprep.subr.mxu0 %v10020_v13 }
 0x4b9   :  { %7760 = vmatprep.subr.mxu1 %v8450_v11  ;;  %7718 = vmatpush3.msra.mxu0 %v10020_v13 }
 0x4ba   :  { %7761 = vmatpush3.msra.mxu1 %v8450_v11  ;;  %7719 = vmatprep.subr.mxu0 %v10021_v58 }
 0x4bb   :  { %7762 = vmatprep.subr.mxu1 %v8467_v6  ;;  %7720 = vmatpush3.msra.mxu0 %v10021_v58 }
 0x4bc   :  { %7763 = vmatpush3.msra.mxu1 %v8467_v6  ;;  %7721 = vmatprep.subr.mxu0 %v10022_v3 }
 0x4bd   :  { %7765 = vmatmul.mubr.f32.vlgmr.msra.gmra.mxu1 %v9287_v60  ;;  %7722 = vmatpush3.msra.mxu0 %v10022_v3 }
 0x4be   :  { %7723 = vmatprep.subr.mxu0 %v10023_v10  ;;  %7774 = vmatprep.subr.mxu1 %v4982_v0 }
 0x4bf   :  { %7724 = vmatpush3.msra.mxu0 %v10023_v10  ;;  %7775 = vmatpush3.msra.mxu1 %v4982_v0  ;;  %v10032_v0 = vld [vmem:[#allocation19_spill] sm:$0xff] }
 0x4c0   :  { %7725 = vmatprep.subr.mxu0 %v10024_v54  ;;  %7776 = vmatprep.subr.mxu1 %v4989_v29 }
 0x4c1   :  { %7726 = vmatpush3.msra.mxu0 %v10024_v54  ;;  %7777 = vmatpush3.msra.mxu1 %v4989_v29  ;;  %v10033_v29 = vld [vmem:[#allocation20_spill] sm:$0xff] }
 0x4c2   :  { %7727 = vmatprep.subr.mxu0 %v10025_v23  ;;  %7778 = vmatprep.mubr.f32.mxu1 %v10026_v30 }
 0x4c3   :  { %7728 = vmatpush3.msra.mxu0 %v10025_v23  ;;  %7779 = vmatmul.mubr.f32.vlgmr.msra.gmra.mxu1 %v10027_v7 }
 0x4c4   :  { %7730 = vmatmul.mubr.f32.vlgmr.msra.gmra.mxu0 %v9287_v60  ;;  %7767 = vmatprep.subr.mxu0 %v9391_v1  ;;  %v10031_v60 = vld [vmem:[#allocation18_spill] sm:$0xff] }
 0x4c5   :  { %7768 = vmatpush3.msra.mxu0 %v9391_v1  ;;  %7771 = vmatprep.mubr.f32.mxu0 %v10028_v50  ;;  %v10042_v50 = vld [vmem:[#allocation37_spill] sm:$0xff] }
 0x4c6   :  { %7769 = vmatprep.subr.mxu0 %v9397_v18  ;;  %7788 = vmatprep.subr.mxu1 %v9391_v1 }
 0x4c7   :  { %7770 = vmatpush3.msra.mxu0 %v9397_v18  ;;  %7789 = vmatpush3.msra.mxu1 %v9391_v1 }
 0x4c8   :  { %7772 = vmatmul.mubr.f32.vlgmr.msra.gmra.mxu0 %v10029_v8  ;;  %7781 = vmatprep.subr.mxu0 %v4979_v33  ;;  %v10043_v8 = vld [vmem:[#allocation39_spill] sm:$0xff] }
 0x4c9   :  { %7782 = vmatpush3.msra.mxu0 %v4979_v33  ;;  %7785 = vmatprep.mubr.f32.mxu0 %v10030_v2  ;;  %v10034_v33 = vld [vmem:[#allocation23_spill] sm:$0xff]  ;;  %v10044_v2 = vld [vmem:[#allocation41_spill] sm:$0xff] }
 0x4ca   :  { %7783 = vmatprep.subr.mxu0 %v4986_v9  ;;  %7790 = vmatprep.subr.mxu1 %v9397_v18 }
 0x4cb   :  { %7784 = vmatpush3.msra.mxu0 %v4986_v9  ;;  %7791 = vmatpush3.msra.mxu1 %v9397_v18  ;;  %v10036_v9 = vld [vmem:[#allocation27_spill] sm:$0xff] }
 0x4cc   :  { %7786 = vmatmul.mubr.f32.vlgmr.msra.gmra.mxu0 %v10031_v60  ;;  %7792 = vmatprep.mubr.f32.mxu1 %v10032_v0  ;;  %v10045_v60 = vld [vmem:[#allocation43_spill] sm:$0xff]  ;;  %v10046_v0 = vld [vmem:[#allocation46_spill] sm:$0xff] }
 0x4cd   :  { %7795 = vmatprep.subr.mxu0 %v4980_v21  ;;  %7793 = vmatmul.mubr.f32.vlgmr.msra.gmra.mxu1 %v10033_v29  ;;  %v10047_v29 = vld [vmem:[#allocation47_spill] sm:$0xff] }
 0x4ce   :  { %7796 = vmatpush3.msra.mxu0 %v4980_v21  ;;  %7802 = vmatprep.subr.mxu1 %v9391_v1  ;;  %v10038_v21 = vld [vmem:[#allocation31_spill] sm:$0xff] }
 0x4cf   :  { %7797 = vmatprep.subr.mxu0 %v4987_v41  ;;  %7803 = vmatpush3.msra.mxu1 %v9391_v1  ;;  %v10035_v1 = vld [vmem:[#allocation25_spill] sm:$0xff] }
 0x4d0   :  { %7798 = vmatpush3.msra.mxu0 %v4987_v41  ;;  %7799 = vmatprep.mubr.f32.mxu0 %v10026_v30  ;;  %v10039_v41 = vld [vmem:[#allocation32_spill] sm:$0xff] }
 0x4d1   :  { %7804 = vmatprep.subr.mxu1 %v9397_v18  ;;  %7800 = vmatmul.mubr.f32.vlgmr.msra.gmra.mxu0 %v10027_v7 }
 0x4d2   :  { %7805 = vmatpush3.msra.mxu1 %v9397_v18  ;;  %7806 = vmatprep.mubr.f32.mxu1 %v10026_v30  ;;  %v10037_v18 = vld [vmem:[#allocation29_spill] sm:$0xff] }
 0x4d3   :  { %7807 = vmatmul.mubr.f32.vlgmr.msra.gmra.mxu1 %v10027_v7  ;;  %7844 = vmatprep.subr.mxu1 %v10034_v33  ;;  %v10040_v30 = vld [vmem:[#allocation33_spill] sm:$0xff]  ;;  %v10041_v7 = vld [vmem:[#allocation34_spill] sm:$0xff] }
 0x4d4   :  { %7845 = vmatpush3.msra.mxu1 %v10034_v33  ;;  %7809 = vmatprep.subr.mxu0 %v8224_v19  ;;  %v10048_v33 = vld [vmem:[#allocation49_spill] sm:$0xff] }
 0x4d5   :  { %7846 = vmatprep.subr.mxu1 %v10035_v1  ;;  %7810 = vmatpush3.msra.mxu0 %v8224_v19 }
 0x4d6   :  { %7847 = vmatpush3.msra.mxu1 %v10035_v1  ;;  %7811 = vmatprep.subr.mxu0 %v8231_v25  ;;  %v10049_v1 = vld [vmem:[#allocation50_spill] sm:$0xff] }
 0x4d7   :  { %7848 = vmatprep.subr.mxu1 %v10036_v9  ;;  %7812 = vmatpush3.msra.mxu0 %v8231_v25 }
 0x4d8   :  { %7849 = vmatpush3.msra.mxu1 %v10036_v9  ;;  %7813 = vmatprep.subr.mxu0 %v8240_v32 }
 0x4d9   :  { %7850 = vmatprep.subr.mxu1 %v10037_v18  ;;  %7814 = vmatpush3.msra.mxu0 %v8240_v32 }
 0x4da   :  { %7851 = vmatpush3.msra.mxu1 %v10037_v18  ;;  %7815 = vmatprep.subr.mxu0 %v8248_v36 }
 0x4db   :  { %7852 = vmatprep.subr.mxu1 %v10038_v21  ;;  %7816 = vmatpush3.msra.mxu0 %v8248_v36 }
 0x4dc   :  { %7853 = vmatpush3.msra.mxu1 %v10038_v21  ;;  %7817 = vmatprep.subr.mxu0 %v8257_v40 }
 0x4dd   :  { %7854 = vmatprep.subr.mxu1 %v10039_v41  ;;  %7818 = vmatpush3.msra.mxu0 %v8257_v40 }
 0x4de   :  { %7855 = vmatpush3.msra.mxu1 %v10039_v41  ;;  %7819 = vmatprep.subr.mxu0 %v8267_v44 }
 0x4df   :  { %7856 = vmatprep.subr.mxu1 %v10040_v30  ;;  %7820 = vmatpush3.msra.mxu0 %v8267_v44 }
 0x4e0   :  { %7857 = vmatpush3.msra.mxu1 %v10040_v30  ;;  %7821 = vmatprep.subr.mxu0 %v8281_v49 }
 0x4e1   :  { %7858 = vmatprep.subr.mxu1 %v10041_v7  ;;  %7822 = vmatpush3.msra.mxu0 %v8281_v49 }
 0x4e2   :  { %7859 = vmatpush3.msra.mxu1 %v10041_v7  ;;  %7823 = vmatprep.subr.mxu0 %v8293_v53 }
 0x4e3   :  { %7860 = vmatprep.subr.mxu1 %v10042_v50  ;;  %7824 = vmatpush3.msra.mxu0 %v8293_v53 }
 0x4e4   :  { %7861 = vmatpush3.msra.mxu1 %v10042_v50  ;;  %7825 = vmatprep.subr.mxu0 %v8382_v14 }
 0x4e5   :  { %7862 = vmatprep.subr.mxu1 %v10043_v8  ;;  %7826 = vmatpush3.msra.mxu0 %v8382_v14 }
 0x4e6   :  { %7863 = vmatpush3.msra.mxu1 %v10043_v8  ;;  %7827 = vmatprep.subr.mxu0 %v8387_v20 }
 0x4e7   :  { %7864 = vmatprep.subr.mxu1 %v10044_v2  ;;  %7828 = vmatpush3.msra.mxu0 %v8387_v20 }
 0x4e8   :  { %7865 = vmatpush3.msra.mxu1 %v10044_v2  ;;  %7829 = vmatprep.subr.mxu0 %v8397_v26 }
 0x4e9   :  { %7866 = vmatprep.subr.mxu1 %v10045_v60  ;;  %7830 = vmatpush3.msra.mxu0 %v8397_v26 }
 0x4ea   :  { %7867 = vmatpush3.msra.mxu1 %v10045_v60  ;;  %7831 = vmatprep.subr.mxu0 %v8409_v37 }
 0x4eb   :  { %7868 = vmatprep.subr.mxu1 %v10046_v0  ;;  %7832 = vmatpush3.msra.mxu0 %v8409_v37 }
 0x4ec   :  { %7869 = vmatpush3.msra.mxu1 %v10046_v0  ;;  %7833 = vmatprep.subr.mxu0 %v8424_v59 }
 0x4ed   :  { %7870 = vmatprep.subr.mxu1 %v10047_v29  ;;  %7834 = vmatpush3.msra.mxu0 %v8424_v59 }
 0x4ee   :  { %7871 = vmatpush3.msra.mxu1 %v10047_v29  ;;  %7835 = vmatprep.subr.mxu0 %v8435_v12 }
 0x4ef   :  { %7872 = vmatprep.subr.mxu1 %v10048_v33  ;;  %7836 = vmatpush3.msra.mxu0 %v8435_v12 }
 0x4f0   :  { %7873 = vmatpush3.msra.mxu1 %v10048_v33  ;;  %7837 = vmatprep.subr.mxu0 %v8450_v11 }
 0x4f1   :  { %7874 = vmatprep.subr.mxu1 %v10049_v1  ;;  %7838 = vmatpush3.msra.mxu0 %v8450_v11 }
 0x4f2   :  { %7875 = vmatpush3.msra.mxu1 %v10049_v1  ;;  %7839 = vmatprep.subr.mxu0 %v8467_v6 }
 0x4f3   :  { %7914 = vmatprep.subr.mxu1 %v8224_v19  ;;  %7840 = vmatpush3.msra.mxu0 %v8467_v6 }
 0x4f4   :  { %7879 = vmatprep.subr.mxu0 %v8238_v31 }
 0x53a   :  { %v7626_v9 = vpop.f32.mrf.mxu1 }
 0x53c   :  { %v4422_v41 = vpop.f32.mrf.mxu1 }
 0x542   :  { %v7591_v18 = vpop.f32.mrf.mxu0 }
 0x543   :  { %v4429_v21 = vadd.f32 %v7626_v9, %v7591_v18  ;;  %v10050_v18 = vld [vmem:[#allocation53_spill] sm:$0xff] }
 0x544   :  { %v4261_v30 = vpop.f32.mrf.mxu0 }
 0x545   :  { %v4423_v7 = vadd.f32 %v4422_v41, %v4261_v30 }
 0x55b   :  { %v7696_v50 = vpop.f32.mrf.mxu1 }
 0x55d   :  { %v4628_v33 = vpop.f32.mrf.mxu1 }
 0x563   :  { %v7661_v8 = vpop.f32.mrf.mxu0 }
 0x564   :  { %v4540_v2 = vadd.f32 %v7661_v8, %v4429_v21  ;;  %v10051_v21 = vld [vmem:[#allocation58_spill] sm:$0xff]  ;;  %v10052_v8 = vld [vmem:[#allocation52_spill] sm:$0xff] }
 0x565   :  { %v4532_v60 = vpop.f32.mrf.mxu0 }
 0x566   :  { %v4533_v0 = vadd.f32 %v4532_v60, %v4423_v7  ;;  %v4637_v29 = vadd.f32 %v7696_v50, %v4540_v2  ;;  %v10053_v7 = vsub.f32 %v10051_v21, %v10052_v8  ;;  %v10054_v2 = vld [vmem:[#allocation55_spill] sm:$0xff] }
 0x568   :  { %v4629_v1 = vadd.f32 %v4628_v33, %v4533_v0  ;;  %v10055_v33 = vld [vmem:[#allocation51_spill] sm:$0xff] }
 0x569   :  { %v6063_v5 = vadd.f32 0.0001, %v10055_v33 }
 0x57d   :  { %v7766_v23 = vpop.f32.mrf.mxu1 }
 0x57f   :  { %v4848_v54 = vpop.f32.mrf.mxu1 }
 0x583   :  { %v7780_v58 = vpop.f32.mrf.mxu1 }
 0x584   :  { %v7731_v10 = vpop.f32.mrf.mxu0 }
 0x585   :  { %v4762_v3 = vadd.f32 %v7731_v10, %v4637_v29  ;;  %v5026_v30 = vpop.f32.mrf.mxu1 }
 0x586   :  { %v4755_v13 = vpop.f32.mrf.mxu0 }
 0x587   :  { %v4855_v15 = vadd.f32 %v7766_v23, %v4762_v3  ;;  %v4756_v4 = vadd.f32 %v4755_v13, %v4629_v1  ;;  %v10056_v13 = vsub.f32 %v9283_v27, %v9013_v62 }
 0x588   :  { %v7773_v9 = vpop.f32.mrf.mxu0 }
 0x589   :  { %v4859_v45 = vsub.f32 %v4855_v15, %v10050_v18  ;;  %v4849_v41 = vadd.f32 %v4848_v54, %v4756_v4  ;;  %v5033_v0 = vadd.f32 %v7780_v58, %v7773_v9  ;;  %v10057_v54 = vld [vmem:[#allocation57_spill] sm:$0xff] }
 0x58a   :  { %v4935_v28 = vpop.f32.mrf.mxu0  ;;  %v6062_v1 = vadd.f32 0.0001, %v10057_v54 }
 0x58b   :  { %v6065_v50 = vadd.f32 %v4859_v45, %v10053_v7  ;;  %v4858_v60 = vsub.f32 %v4849_v41, %v10054_v2  ;;  %v5027_v23 = vadd.f32 %v5026_v30, %v4935_v28 }
 0x58c   :  { %v7787_v10 = vpop.f32.mrf.mxu0 }
 0x58d   :  { %v6067_v29 = vadd.f32 0.0009, %v6065_v50  ;;  %v6064_v3 = vadd.f32 %v4858_v60, %v10056_v13  ;;  %v5116_v15 = vadd.f32 %v7787_v10, %v5033_v0  ;;  %v7794_v4 = vpop.f32.mrf.mxu1 }
 0x58e   :  { %v5108_v18 = vpop.f32.mrf.mxu0 }
 0x58f   :  { %v9542_v56 = vmul.f32 %v6067_v29, %v6063_v5  ;;  %v6066_v45 = vadd.f32 0.0009, %v6064_v3  ;;  %v5199_v21 = vadd.f32 %v7794_v4, %v5116_v15  ;;  %v5109_v41 = vadd.f32 %v5108_v18, %v5027_v23  ;;  %v5190_v58 = vpop.f32.mrf.mxu1 }
 0x591   :  { %v9544_v9 = vmul.f32 %v6066_v45, %v6062_v1  ;;  %v5191_v8 = vadd.f32 %v5190_v58, %v5109_v41  ;;  %v7801_v7 = vpop.f32.mrf.mxu0  ;;  %8026 = vrcp.f32 %v9542_v56  ;;  %v10071_v1 = vld [vmem:[#allocation56_spill] sm:$0xff] }
 0x592   :  { %v5282_v50 = vadd.f32 %v7801_v7, %v5199_v21  ;;  %v6050_v18 = vmul.f32 2.0, %v10071_v1 }
 0x593   :  { %v7808_v2 = vpop.f32.mrf.mxu1  ;;  %v5275_v62 = vpop.f32.mrf.mxu0  ;;  %8028 = vrcp.f32 %v9544_v9 }
 0x594   :  { %v5361_v27 = vadd.f32 %v7808_v2, %v5282_v50  ;;  %v5276_v28 = vadd.f32 %v5275_v62, %v5191_v8  ;;  %v6052_v9 = vadd.f32 0.0001, %v6050_v18 }
 0x595   :  { %v5354_v30 = vpop.f32.mrf.mxu1 }
 0x596   :  { %v9546_v60 = vand.u32 4294901760, %v5361_v27  ;;  %v5355_v0 = vadd.f32 %v5354_v30, %v5276_v28 }
 0x598   :  { %v9549_v5 = vsub.f32 %v5361_v27, %v9546_v60  ;;  %v9551_v33 = vand.u32 4294901760, %v5355_v0 }
 0x59a   :  { %v5457_v10 = vand.u32 4294901760, %v9549_v5  ;;  %v5446_v29 = vsub.f32 %v5355_v0, %v9551_v33  ;;  %7876 = vmatprep.mubr.f32.mxu1 %v9551_v33 }
 0x59b   :  { %7877 = vmatmul.mubr.f32.vlgmr.msra.gmra.mxu1 %v9546_v60 }
 0x59c   :  { %7915 = vmatpush3.msra.mxu1 %v8224_v19  ;;  %v5447_v13 = vand.u32 4294901760, %v5446_v29  ;;  %v5458_v3 = vsub.f32 %v9549_v5, %v5457_v10 }
 0x59d   :  { %7916 = vmatprep.subr.mxu1 %v8231_v25 }
 0x59e   :  { %7917 = vmatpush3.msra.mxu1 %v8231_v25  ;;  %7946 = vmatprep.mubr.f32.mxu1 %v5447_v13  ;;  %v5448_v23 = vsub.f32 %v5446_v29, %v5447_v13  ;;  %v5459_v4 = vand.u32 4294901760, %v5458_v3  ;;  %v8027_v50 = vpop.eup %8026 }
 0x59f   :  { %7918 = vmatprep.subr.mxu1 %v8240_v32 }
 0x5a0   :  { %7919 = vmatpush3.msra.mxu1 %v8240_v32  ;;  %v5449_v15 = vand.u32 4294901760, %v5448_v23  ;;  %v8029_v27 = vpop.eup %8028 }
 0x5a1   :  { %7920 = vmatprep.subr.mxu1 %v8248_v36 }
 0x5a2   :  { %7921 = vmatpush3.msra.mxu1 %v8248_v36  ;;  %7841 = vmatprep.mubr.f32.mxu0 %v5449_v15 }
 0x5a3   :  { %7922 = vmatprep.subr.mxu1 %v8257_v40  ;;  %7842 = vmatmul.mubr.f32.vlgmr.msra.gmra.mxu0 %v5459_v4 }
 0x5a4   :  { %7880 = vmatpush3.msra.mxu0 %v8238_v31  ;;  %7923 = vmatpush3.msra.mxu1 %v8257_v40  ;;  %v10060_v31 = vld [vmem:[#allocation28_spill] sm:$0xff] }
 0x5a5   :  { %7881 = vmatprep.subr.mxu0 %v8246_v35  ;;  %7911 = vmatprep.mubr.f32.mxu0 %v5446_v29 }
 0x5a6   :  { %7924 = vmatprep.subr.mxu1 %v8267_v44  ;;  %7882 = vmatpush3.msra.mxu0 %v8246_v35  ;;  %v10062_v35 = vld [vmem:[#allocation35_spill] sm:$0xff] }
 0x5a7   :  { %7925 = vmatpush3.msra.mxu1 %v8267_v44  ;;  %7883 = vmatprep.subr.mxu0 %v8255_v39 }
 0x5a8   :  { %7926 = vmatprep.subr.mxu1 %v8281_v49  ;;  %7884 = vmatpush3.msra.mxu0 %v8255_v39  ;;  %v10065_v39 = vld [vmem:[#allocation40_spill] sm:$0xff] }
 0x5a9   :  { %7927 = vmatpush3.msra.mxu1 %v8281_v49  ;;  %7885 = vmatprep.subr.mxu0 %v8265_v43 }
 0x5aa   :  { %7928 = vmatprep.subr.mxu1 %v8293_v53  ;;  %7886 = vmatpush3.msra.mxu0 %v8265_v43  ;;  %v10068_v43 = vld [vmem:[#allocation45_spill] sm:$0xff] }
 0x5ab   :  { %7929 = vmatpush3.msra.mxu1 %v8293_v53  ;;  %7887 = vmatprep.subr.mxu0 %v8279_v48 }
 0x5ac   :  { %7930 = vmatprep.subr.mxu1 %v8382_v14  ;;  %7888 = vmatpush3.msra.mxu0 %v8279_v48 }
 0x5ad   :  { %7931 = vmatpush3.msra.mxu1 %v8382_v14  ;;  %7889 = vmatprep.subr.mxu0 %v8291_v52 }
 0x5ae   :  { %7932 = vmatprep.subr.mxu1 %v8387_v20  ;;  %7890 = vmatpush3.msra.mxu0 %v8291_v52 }
 0x5af   :  { %7933 = vmatpush3.msra.mxu1 %v8387_v20  ;;  %7891 = vmatprep.subr.mxu0 %v8305_v57 }
 0x5b0   :  { %7934 = vmatprep.subr.mxu1 %v8397_v26  ;;  %7892 = vmatpush3.msra.mxu0 %v8305_v57 }
 0x5b1   :  { %7935 = vmatpush3.msra.mxu1 %v8397_v26  ;;  %7893 = vmatprep.subr.mxu0 %v8319_v61 }
 0x5b2   :  { %7936 = vmatprep.subr.mxu1 %v8409_v37  ;;  %7894 = vmatpush3.msra.mxu0 %v8319_v61 }
 0x5b3   :  { %7937 = vmatpush3.msra.mxu1 %v8409_v37  ;;  %7895 = vmatprep.subr.mxu0 %v8385_v17 }
 0x5b4   :  { %7938 = vmatprep.subr.mxu1 %v8424_v59  ;;  %7896 = vmatpush3.msra.mxu0 %v8385_v17 }
 0x5b5   :  { %7939 = vmatpush3.msra.mxu1 %v8424_v59  ;;  %7897 = vmatprep.subr.mxu0 %v8395_v24 }
 0x5b6   :  { %7940 = vmatprep.subr.mxu1 %v8435_v12  ;;  %7898 = vmatpush3.msra.mxu0 %v8395_v24 }
 0x5b7   :  { %7941 = vmatpush3.msra.mxu1 %v8435_v12  ;;  %7899 = vmatprep.subr.mxu0 %v8407_v34 }
 0x5b8   :  { %7942 = vmatprep.subr.mxu1 %v8450_v11  ;;  %7900 = vmatpush3.msra.mxu0 %v8407_v34 }
 0x5b9   :  { %7943 = vmatpush3.msra.mxu1 %v8450_v11  ;;  %7901 = vmatprep.subr.mxu0 %v8421_v55 }
 0x5ba   :  { %7944 = vmatprep.subr.mxu1 %v8467_v6  ;;  %7902 = vmatpush3.msra.mxu0 %v8421_v55 }
 0x5bb   :  { %7945 = vmatpush3.msra.mxu1 %v8467_v6  ;;  %7903 = vmatprep.subr.mxu0 %v8439_v16 }
 0x5bc   :  { %7947 = vmatmul.mubr.f32.vlgmr.msra.gmra.mxu1 %v5457_v10  ;;  %7984 = vmatprep.subr.mxu1 %v8224_v19 }
 0x5bd   :  { %7904 = vmatpush3.msra.mxu0 %v8439_v16  ;;  %7985 = vmatpush3.msra.mxu1 %v8224_v19  ;;  %v10058_v19 = vld [vmem:[#allocation24_spill] sm:$0xff] }
 0x5be   :  { %8016 = vmatprep.mubr.f32.mxu1 %v9551_v33  ;;  %7905 = vmatprep.subr.mxu0 %v8448_v46 }
 0x5bf   :  { %7986 = vmatprep.subr.mxu1 %v8231_v25  ;;  %7906 = vmatpush3.msra.mxu0 %v8448_v46  ;;  %v10070_v46 = vld [vmem:[#allocation54_spill] sm:$0xff] }
 0x5c0   :  { %7987 = vmatpush3.msra.mxu1 %v8231_v25  ;;  %7907 = vmatprep.subr.mxu0 %v8465_v63  ;;  %v10059_v25 = vld [vmem:[#allocation26_spill] sm:$0xff] }
 0x5c1   :  { %7988 = vmatprep.subr.mxu1 %v8240_v32  ;;  %7908 = vmatpush3.msra.mxu0 %v8465_v63  ;;  %v6051_v63 = vmul.f32 2.0, %v10070_v46 }
 0x5c2   :  { %7989 = vmatpush3.msra.mxu1 %v8240_v32  ;;  %7909 = vmatprep.subr.mxu0 %v8481_v22  ;;  %v10061_v32 = vld [vmem:[#allocation30_spill] sm:$0xff] }
 0x5c3   :  { %7990 = vmatprep.subr.mxu1 %v8248_v36  ;;  %7910 = vmatpush3.msra.mxu0 %v8481_v22  ;;  %v6053_v21 = vadd.f32 0.0001, %v6051_v63 }
 0x5c4   :  { %7991 = vmatpush3.msra.mxu1 %v8248_v36  ;;  %7912 = vmatmul.mubr.f32.vlgmr.msra.gmra.mxu0 %v9549_v5  ;;  %v10063_v36 = vld [vmem:[#allocation36_spill] sm:$0xff] }
 0x5c5   :  { %7949 = vmatprep.subr.mxu0 %v8252_v38  ;;  %7992 = vmatprep.subr.mxu1 %v8257_v40 }
 0x5c6   :  { %7950 = vmatpush3.msra.mxu0 %v8252_v38  ;;  %7981 = vmatprep.mubr.f32.mxu0 %v9551_v33  ;;  %v10064_v38 = vld [vmem:[#allocation38_spill] sm:$0xff] }
 0x5c7   :  { %7993 = vmatpush3.msra.mxu1 %v8257_v40  ;;  %7951 = vmatprep.subr.mxu0 %v8262_v42  ;;  %v10066_v40 = vld [vmem:[#allocation42_spill] sm:$0xff] }
 0x5c8   :  { %7994 = vmatprep.subr.mxu1 %v8267_v44  ;;  %7952 = vmatpush3.msra.mxu0 %v8262_v42  ;;  %v10067_v42 = vld [vmem:[#allocation44_spill] sm:$0xff] }
 0x5c9   :  { %7995 = vmatpush3.msra.mxu1 %v8267_v44  ;;  %7953 = vmatprep.subr.mxu0 %v8276_v47  ;;  %v10069_v44 = vld [vmem:[#allocation48_spill] sm:$0xff] }
 0x5ca   :  { %7996 = vmatprep.subr.mxu1 %v8281_v49  ;;  %7954 = vmatpush3.msra.mxu0 %v8276_v47 }
 0x5cb   :  { %7997 = vmatpush3.msra.mxu1 %v8281_v49  ;;  %7955 = vmatprep.subr.mxu0 %v8288_v51 }
 0x5cc   :  { %7998 = vmatprep.subr.mxu1 %v8293_v53  ;;  %7956 = vmatpush3.msra.mxu0 %v8288_v51 }
 0x5cd   :  { %7999 = vmatpush3.msra.mxu1 %v8293_v53  ;;  %7957 = vmatprep.subr.mxu0 %v10058_v19 }
 0x5ce   :  { %8000 = vmatprep.subr.mxu1 %v8382_v14  ;;  %7958 = vmatpush3.msra.mxu0 %v10058_v19 }
 0x5cf   :  { %8001 = vmatpush3.msra.mxu1 %v8382_v14  ;;  %7959 = vmatprep.subr.mxu0 %v10059_v25 }
 0x5d0   :  { %8002 = vmatprep.subr.mxu1 %v8387_v20  ;;  %7960 = vmatpush3.msra.mxu0 %v10059_v25 }
 0x5d1   :  { %8003 = vmatpush3.msra.mxu1 %v8387_v20  ;;  %7961 = vmatprep.subr.mxu0 %v10060_v31 }
 0x5d2   :  { %8004 = vmatprep.subr.mxu1 %v8397_v26  ;;  %7962 = vmatpush3.msra.mxu0 %v10060_v31 }
 0x5d3   :  { %8005 = vmatpush3.msra.mxu1 %v8397_v26  ;;  %7963 = vmatprep.subr.mxu0 %v10061_v32 }
 0x5d4   :  { %8006 = vmatprep.subr.mxu1 %v8409_v37  ;;  %7964 = vmatpush3.msra.mxu0 %v10061_v32 }
 0x5d5   :  { %8007 = vmatpush3.msra.mxu1 %v8409_v37  ;;  %7965 = vmatprep.subr.mxu0 %v10062_v35 }
 0x5d6   :  { %8008 = vmatprep.subr.mxu1 %v8424_v59  ;;  %7966 = vmatpush3.msra.mxu0 %v10062_v35 }
 0x5d7   :  { %8009 = vmatpush3.msra.mxu1 %v8424_v59  ;;  %7967 = vmatprep.subr.mxu0 %v10063_v36 }
 0x5d8   :  { %8010 = vmatprep.subr.mxu1 %v8435_v12  ;;  %7968 = vmatpush3.msra.mxu0 %v10063_v36 }
 0x5d9   :  { %8011 = vmatpush3.msra.mxu1 %v8435_v12  ;;  %7969 = vmatprep.subr.mxu0 %v10064_v38 }
 0x5da   :  { %8012 = vmatprep.subr.mxu1 %v8450_v11  ;;  %7970 = vmatpush3.msra.mxu0 %v10064_v38 }
 0x5db   :  { %8013 = vmatpush3.msra.mxu1 %v8450_v11  ;;  %7971 = vmatprep.subr.mxu0 %v10065_v39 }
 0x5dc   :  { %8014 = vmatprep.subr.mxu1 %v8467_v6  ;;  %7972 = vmatpush3.msra.mxu0 %v10065_v39 }
 0x5dd   :  { %8015 = vmatpush3.msra.mxu1 %v8467_v6  ;;  %7973 = vmatprep.subr.mxu0 %v10066_v40 }
 0x5de   :  { %8017 = vmatmul.mubr.f32.vlgmr.msra.gmra.mxu1 %v9546_v60  ;;  %7974 = vmatpush3.msra.mxu0 %v10066_v40 }
 0x5df   :  { %7975 = vmatprep.subr.mxu0 %v10067_v42 }
 0x5e0   :  { %7976 = vmatpush3.msra.mxu0 %v10067_v42 }
 0x5e1   :  { %7977 = vmatprep.subr.mxu0 %v10068_v43 }
 0x5e2   :  { %7978 = vmatpush3.msra.mxu0 %v10068_v43 }
 0x5e3   :  { %7979 = vmatprep.subr.mxu0 %v10069_v44 }
 0x5e4   :  { %7980 = vmatpush3.msra.mxu0 %v10069_v44 }
 0x5e5   :  { %7982 = vmatmul.mubr.f32.vlgmr.msra.gmra.mxu0 %v9546_v60 }
 0x65b   :  { %v7878_v48 = vpop.f32.mrf.mxu1 }
 0x65d   :  { %v5612_v52 = vpop.f32.mrf.mxu1 }
 0x663   :  { %v7843_v47 = vpop.f32.mrf.mxu0 }
 0x664   :  { %v5619_v53 = vadd.f32 %v7878_v48, %v7843_v47 }
 0x665   :  { %v5451_v49 = vpop.f32.mrf.mxu0 }
 0x666   :  { %v5613_v6 = vadd.f32 %v5612_v52, %v5451_v49 }
 0x67c   :  { %v7948_v57 = vpop.f32.mrf.mxu1 }
 0x67e   :  { %v5818_v17 = vpop.f32.mrf.mxu1 }
 0x684   :  { %v7913_v51 = vpop.f32.mrf.mxu0 }
 0x685   :  { %v5730_v11 = vadd.f32 %v7913_v51, %v5619_v53 }
 0x686   :  { %v5722_v61 = vpop.f32.mrf.mxu0 }
 0x687   :  { %v5723_v14 = vadd.f32 %v5722_v61, %v5613_v6  ;;  %v5827_v20 = vadd.f32 %v7948_v57, %v5730_v11 }
 0x689   :  { %v5819_v37 = vadd.f32 %v5818_v17, %v5723_v14 }
 0x69e   :  { %v8018_v24 = vpop.f32.mrf.mxu1 }
 0x6a0   :  { %v6038_v16 = vpop.f32.mrf.mxu1 }
 0x6a5   :  { %v7983_v26 = vpop.f32.mrf.mxu0 }
 0x6a6   :  { %v5952_v34 = vadd.f32 %v7983_v26, %v5827_v20 }
 0x6a7   :  { %v5945_v55 = vpop.f32.mrf.mxu0 }
 0x6a8   :  { %v6045_v59 = vadd.f32 %v8018_v24, %v5952_v34  ;;  %v5946_v12 = vadd.f32 %v5945_v55, %v5819_v37 }
 0x6aa   :  { %v6049_v22 = vsub.f32 %v6045_v59, %v10070_v46  ;;  %v6039_v54 = vadd.f32 %v6038_v16, %v5946_v12 }
 0x6ac   :  { %v6055_v45 = vmul.f32 2.0, %v6049_v22  ;;  %v6048_v56 = vsub.f32 %v6039_v54, %v10071_v1 }
 0x6ae   :  { %v6057_v41 = vadd.f32 0.0009, %v6055_v45  ;;  %v6054_v58 = vmul.f32 2.0, %v6048_v56 }
 0x6b0   :  { %v6059_v8 = vmul.f32 %v6057_v41, %v6053_v21  ;;  %v6056_v7 = vadd.f32 0.0009, %v6054_v58 }
 0x6b2   :  { %v6073_v2 = vmul.f32 %v8027_v50, %v6059_v8  ;;  %v6058_v62 = vmul.f32 %v6056_v7, %v6052_v9 }
 0x6b4   :  { %v6072_v28 = vmul.f32 %v8029_v27, %v6058_v62 }
 0x6b6   :  { %v6074_v30 = vadd.f32 %v6073_v2, %v6072_v28 }
 0x6b8   :  { %v6075_v60 = vrot.slane %v6074_v30, 4 }
 0x6ba   :  { %v6076_v0 = vadd.f32 %v6075_v60, %v6074_v30 }
 0x6bc   :  { %v6077_v5 = vrot.slane %v6076_v0, 2 }
 0x6be   :  { %v6078_v33 = vadd.f32 %v6077_v5, %v6076_v0 }
 0x6c0   :  { %v6079_v10 = vrot.slane %v6078_v33, 1 }
 0x6c2   :  { %v6080_v29 = vadd.f32 %v6079_v10, %v6078_v33 }
 0x6c4   :  { %6081 = vst [vmem:[#allocation10] sm:$0x1] %v6080_v29 }
 0x6c5   :  { %8127 = shalt.err (!%p8124_p10)
}
 0x6c6   :  { %6091 = dma.vmem_to_hbm [thread:$0]  %s6089_s3, 16, %s9706_s4, [#allocation4]  }
 0x6c7   :  { %8142 = dma.done.wait [#allocation4], 16  }
 0x6c8   :  { %8143 = vsyncadd [#allocation4], 4294967280 }
 0x6c9   :  { %6095 = vsyncpa [#allocation3], 1 }
 0x6ca   :  { %6096 = vsyncpa [#allocation6], 1 }
 0x6cb   :  { %6097 = vsyncpa [#allocation9], 1 }
 0x6cc   :  { %6098 = vsyncpa [#allocation4], 1 }

</bundles_post_ra>
